<compile_context>
chip_gen: v7x
topology: tpu7x:2x2x1
jax: 0.10.0
libtpu: 0.0.40
codegen_flags: <defaults>
</compile_context>

<pallas_src>
import jax
import jax.numpy as jnp
from jax.experimental import pallas as pl
from jax.experimental.pallas import tpu as pltpu

# ---------------- configuration ----------------
IN_CH = 2
IMG = 16
PATCH = 4
HIDDEN = 32            # must equal PATCH**2 * IN_CH (required by unpatchify)
HEADS = 4
MLP_RATIO = 4.0
MLP = int(HIDDEN * MLP_RATIO)

GRID_H = IMG // PATCH          # patches per side
T = GRID_H * GRID_H            # num tokens (16)
P = IN_CH * PATCH * PATCH      # flattened patch dim (32)
HEAD_DIM = HIDDEN // HEADS     # 8
EPS = 1e-6

assert HIDDEN == P, "unpatchify requires hidden == patch**2 * channels"


# ---------------- Pallas kernel ----------------
def dit_block_kernel(patches_ref, cexp_ref, bpos_ref,
                     w_pack_ref, b_pack_ref, w_fc2_ref,
                     out_ref):
    D = HIDDEN
    hd = HEAD_DIM
    BT = out_ref.shape[0]          # BB * T rows in this block (static)
    BB = BT // T

    # ---- packed parameters: static ref-slice loads (cheap) ----
    w_emb = w_pack_ref[:, 0:D]
    w_ada = w_pack_ref[:, D:7 * D]
    w_qkv = w_pack_ref[:, 7 * D:10 * D]          # 1/sqrt(hd) pre-folded into Q cols
    w_proj = w_pack_ref[:, 10 * D:11 * D]
    w_fc1 = w_pack_ref[:, 11 * D:11 * D + MLP]
    b_ada = b_pack_ref[:, 0:6 * D]
    b_qkv = b_pack_ref[:, 6 * D:9 * D]
    b_proj = b_pack_ref[:, 9 * D:10 * D]
    b_fc1 = b_pack_ref[:, 10 * D:10 * D + MLP]
    b_fc2 = b_pack_ref[:, 10 * D + MLP:11 * D + MLP]

    # ---- patch embedding (Conv2d stride=p == matmul) + (bias + pos_embed) ----
    x = jnp.dot(patches_ref[...], w_emb,
                preferred_element_type=jnp.float32)            # (BT, D)
    x = x + bpos_ref[...]                                      # (BT, D)

    # ---- adaLN modulation on the pre-expanded conditioning (row b*T+t = c[b]) ----
    c = cexp_ref[...]                                          # (BT, D)
    ada = (jnp.dot(c * jax.nn.sigmoid(c), w_ada,
                   preferred_element_type=jnp.float32) + b_ada)  # (BT, 6D)
    shift_msa = ada[:, 0 * D:1 * D]
    scale_msa = ada[:, 1 * D:2 * D]
    gate_msa = ada[:, 2 * D:3 * D]
    shift_mlp = ada[:, 3 * D:4 * D]
    scale_mlp = ada[:, 4 * D:5 * D]
    gate_mlp = ada[:, 5 * D:6 * D]

    def layernorm(v):
        mu = jnp.mean(v, axis=-1, keepdims=True)
        var = jnp.mean((v - mu) * (v - mu), axis=-1, keepdims=True)
        return (v - mu) * jax.lax.rsqrt(var + EPS)

    # ---- attention branch ----
    xm = layernorm(x) * (1.0 + scale_msa) + shift_msa          # (BT, D)
    qkv = (jnp.dot(xm, w_qkv, preferred_element_type=jnp.float32)
           + b_qkv)                                            # (BT, 3D)
    scores = []
    vals = []
    for h in range(HEADS):                                     # static unroll
        qh = qkv[:, h * hd:(h + 1) * hd].reshape(BB, T, hd)
        kh = qkv[:, D + h * hd:D + (h + 1) * hd].reshape(BB, T, hd)
        vh = qkv[:, 2 * D + h * hd:2 * D + (h + 1) * hd].reshape(BB, T, hd)
        scores.append(jnp.einsum('bqd,bkd->bqk', qh, kh,
                                 preferred_element_type=jnp.float32))  # (BB,T,T)
        vals.append(vh)
    # one softmax for all 4 heads: stack per-head scores along the token axis
    # (T=16 rows each -> tile-aligned concat / slices, no masking needed)
    s_all = jnp.concatenate(scores, axis=1)                    # (BB, H*T, T)
    s_all = s_all - jnp.max(s_all, axis=-1, keepdims=True)
    e_all = jnp.exp(s_all)
    p_all = e_all / jnp.sum(e_all, axis=-1, keepdims=True)     # exact normalization
    heads = []
    for h in range(HEADS):
        ph = p_all[:, h * T:(h + 1) * T, :]                    # (BB, T, T)
        oh = jnp.einsum('bqk,bkd->bqd', ph, vals[h],
                        preferred_element_type=jnp.float32)    # (BB, T, hd)
        heads.append(oh.reshape(BT, hd))
    attn = jnp.concatenate(heads, axis=-1)                     # (BT, D), heads adjacent
    attn = (jnp.dot(attn, w_proj, preferred_element_type=jnp.float32)
            + b_proj)                                          # single K=32 matmul
    x = x + gate_msa * attn

    # ---- MLP branch ----
    xm2 = layernorm(x) * (1.0 + scale_mlp) + shift_mlp
    h1 = (jnp.dot(xm2, w_fc1, preferred_element_type=jnp.float32)
          + b_fc1)                                             # (BT, MLP)
    h1 = jax.nn.gelu(h1, approximate=True)                     # tanh GELU
    mlp_out = (jnp.dot(h1, w_fc2_ref[...],
                       preferred_element_type=jnp.float32) + b_fc2)
    x = x + gate_mlp * mlp_out

    out_ref[...] = x.astype(out_ref.dtype)


# ---------------- batch-block selection ----------------
def _choose_batch_block(n, bb_max=128):
    """Return (BB, N_pad, grid). Big blocks amortize per-step overhead; grid is
    forced to >= 2 only when blocks stay >= 8 elements (v7x megacore); tiny
    batches get BB = N with zero padding."""
    g = max(1, -(-n // bb_max))
    if g == 1 and n >= 16:
        g = 2
    bb = -(-n // g)
    return bb, g * bb, g


# ---------------- wrapper (glue in plain JAX) ----------------
@jax.jit
def dit_block_patch(x, c, params):
    """x: (N, C, H, W) NCHW float32, c: (N, HIDDEN) float32."""
    N = x.shape[0]
    h = w = GRID_H

    # patch extraction: (N,C,H,W) -> (N*T, C*p*p), feature order (c, ph, pw)
    patches = x.reshape(N, IN_CH, h, PATCH, w, PATCH)
    patches = patches.transpose(0, 2, 4, 1, 3, 5).reshape(N * T, P)

    BB, N_pad, grid = _choose_batch_block(N)
    BT = BB * T

    c_pad = c
    if N_pad != N:
        patches = jnp.pad(patches, ((0, (N_pad - N) * T), (0, 0)))
        c_pad = jnp.pad(c, ((0, N_pad - N), (0, 0)))

    # expand conditioning to one row per (batch, token): kernel stays fully 2-D
    c_exp = jnp.broadcast_to(c_pad[:, None, :], (N_pad, T, HIDDEN))
    c_exp = c_exp.reshape(N_pad * T, HIDDEN)

    # constant parameter prep: fold 1/sqrt(hd) into Q weights, merge bias+pos,
    # pack the (32, .) weights / row biases into single operands
    scale = 1.0 / jnp.sqrt(jnp.float32(HEAD_DIM))
    qcol = jnp.concatenate([jnp.full((HIDDEN,), scale, jnp.float32),
                            jnp.ones((2 * HIDDEN,), jnp.float32)])
    w_qkv_s = params["w_qkv"] * qcol[None, :]
    b_qkv_s = params["b_qkv"] * qcol[None, :]
    bpos = jnp.tile(params["b_emb"] + params["pos_embed"], (BB, 1))   # (BT, HIDDEN)
    w_pack = jnp.concatenate([params["w_emb"], params["w_ada"], w_qkv_s,
                              params["w_proj"], params["w_fc1"]], axis=1)  # (32, 480)
    b_pack = jnp.concatenate([params["b_ada"], b_qkv_s, params["b_proj"],
                              params["b_fc1"], params["b_fc2"]], axis=1)   # (1, 480)

    in_specs = [
        pl.BlockSpec((BT, P), lambda n: (n, 0)),                 # patches
        pl.BlockSpec((BT, HIDDEN), lambda n: (n, 0)),            # expanded conditioning
        pl.BlockSpec(bpos.shape, lambda n: (0, 0)),              # bias + pos (shared)
        pl.BlockSpec(w_pack.shape, lambda n: (0, 0)),            # packed weights
        pl.BlockSpec(b_pack.shape, lambda n: (0, 0)),            # packed biases
        pl.BlockSpec((MLP, HIDDEN), lambda n: (0, 0)),           # w_fc2
    ]
    out_specs = pl.BlockSpec((BT, HIDDEN), lambda n: (n, 0))

    tokens = pl.pallas_call(
        dit_block_kernel,
        out_shape=jax.ShapeDtypeStruct((N_pad * T, HIDDEN), jnp.float32),
        grid=(grid,),
        in_specs=in_specs,
        out_specs=out_specs,
        compiler_params=pltpu.CompilerParams(
            dimension_semantics=("parallel",)),
    )(patches, c_exp, bpos, w_pack, b_pack, params["w_fc2"])

    tokens = tokens.reshape(N_pad, T, HIDDEN)[:N]
    # unpatchify: (N, T, p*p*C) -> (N, C, H, W)
    imgs = tokens.reshape(N, h, w, PATCH, PATCH, IN_CH)
    imgs = imgs.transpose(0, 5, 1, 3, 2, 4).reshape(N, IN_CH, h * PATCH, w * PATCH)
    return imgs


# ---------------- pure-JAX reference (for verification) ----------------
def ref_forward(x, c, params):
    N = x.shape[0]
    h = w = GRID_H
    patches = x.reshape(N, IN_CH, h, PATCH, w, PATCH)
    patches = patches.transpose(0, 2, 4, 1, 3, 5).reshape(N, T, P)
    xt = patches @ params["w_emb"] + params["b_emb"] + params["pos_embed"]

    c_silu = c * jax.nn.sigmoid(c)
    ada = c_silu @ params["w_ada"] + params["b_ada"]
    sh_msa, sc_msa, g_msa, sh_mlp, sc_mlp, g_mlp = jnp.split(ada, 6, axis=1)

    def ln(v):
        mu = jnp.mean(v, axis=-1, keepdims=True)
        var = jnp.mean((v - mu) ** 2, axis=-1, keepdims=True)
        return (v - mu) / jnp.sqrt(var + EPS)

    def modulate(v, shift, scale):
        return v * (1 + scale[:, None, :]) + shift[:, None, :]

    xm = modulate(ln(xt), sh_msa, sc_msa)
    qkv = xm @ params["w_qkv"] + params["b_qkv"]
    qkv = qkv.reshape(N, T, 3, HEADS, HEAD_DIM).transpose(2, 0, 3, 1, 4)
    q, k, v = qkv[0], qkv[1], qkv[2]                    # (N, H, T, hd)
    s = (q * (HEAD_DIM ** -0.5)) @ jnp.swapaxes(k, -1, -2)
    a = jax.nn.softmax(s, axis=-1)
    o = (a @ v).transpose(0, 2, 1, 3).reshape(N, T, HIDDEN)
    o = o @ params["w_proj"] + params["b_proj"]
    xt = xt + g_msa[:, None, :] * o

    xm2 = modulate(ln(xt), sh_mlp, sc_mlp)
    h1 = jax.nn.gelu(xm2 @ params["w_fc1"] + params["b_fc1"], approximate=True)
    m = h1 @ params["w_fc2"] + params["b_fc2"]
    xt = xt + g_mlp[:, None, :] * m

    imgs = xt.reshape(N, h, w, PATCH, PATCH, IN_CH)
    imgs = imgs.transpose(0, 5, 1, 3, 2, 4).reshape(N, IN_CH, h * PATCH, w * PATCH)
    return imgs


# ---------------- deterministic parameter init ----------------
def init_params(key):
    ks = jax.random.split(key, 16)
    n = lambda k, shape, s=0.02: (s * jax.random.normal(k, shape)).astype(jnp.float32)
    return {
        "w_emb": n(ks[0], (P, HIDDEN)),
        "b_emb": n(ks[1], (1, HIDDEN)),
        "pos_embed": jnp.zeros((T, HIDDEN), jnp.float32),   # zeros as in module
        "w_ada": n(ks[2], (HIDDEN, 6 * HIDDEN)),
        "b_ada": n(ks[3], (1, 6 * HIDDEN)),
        "w_qkv": n(ks[4], (HIDDEN, 3 * HIDDEN)),
        "b_qkv": n(ks[5], (1, 3 * HIDDEN)),
        "w_proj": n(ks[6], (HIDDEN, HIDDEN)),
        "b_proj": n(ks[7], (1, HIDDEN)),
        "w_fc1": n(ks[8], (HIDDEN, MLP)),
        "b_fc1": n(ks[9], (1, MLP)),
        "w_fc2": n(ks[10], (MLP, HIDDEN)),
        "b_fc2": n(ks[11], (1, HIDDEN)),
    }


if __name__ == "__main__":
    key = jax.random.PRNGKey(0)
    kx, kc, kp = jax.random.split(key, 3)
    N = 2
    x = jax.random.normal(kx, (N, IN_CH, IMG, IMG), jnp.float32)   # NCHW
    c = jax.random.normal(kc, (N, HIDDEN), jnp.float32)
    params = init_params(kp)

    out = dit_block_patch(x, c, params)
    out = jax.block_until_ready(out)

    ref = ref_forward(x, c, params)
    assert out.shape == (N, IN_CH, IMG, IMG), out.shape
    assert jnp.allclose(out, ref, atol=1e-4, rtol=1e-4), float(
        jnp.max(jnp.abs(out - ref)))

    print("KERNEL_OK")
</pallas_src>

<mosaic_0001>
module attributes {stable_mosaic.version = 11 : i64} {
  func.func @dit_block_kernel(%arg0: i32, %arg1: memref<32x32xf32, #tpu.memory_space<vmem>>, %arg2: memref<32x32xf32, #tpu.memory_space<vmem>>, %arg3: memref<32x32xf32, #tpu.memory_space<vmem>>, %arg4: memref<32x480xf32, #tpu.memory_space<vmem>>, %arg5: memref<1x480xf32, #tpu.memory_space<vmem>>, %arg6: memref<128x32xf32, #tpu.memory_space<vmem>>, %arg7: memref<32x32xf32, #tpu.memory_space<vmem>>) attributes {dimension_semantics = [#tpu.dimension_semantics<parallel>], iteration_bounds = array<i64: 1>, scalar_prefetch = 0 : i64, scratch_operands = 0 : i64, tpu.core_type = #tpu.core_type<tc>, window_params = [{transform_indices = @transform_0, window_bounds = array<i64: 32, 32>}, {transform_indices = @transform_1, window_bounds = array<i64: 32, 32>}, {pipeline_mode = #tpu.pipeline_mode<synchronous>, transform_indices = @transform_2, window_bounds = array<i64: 32, 32>}, {pipeline_mode = #tpu.pipeline_mode<synchronous>, transform_indices = @transform_3, window_bounds = array<i64: 32, 480>}, {pipeline_mode = #tpu.pipeline_mode<synchronous>, transform_indices = @transform_4, window_bounds = array<i64: 1, 480>}, {pipeline_mode = #tpu.pipeline_mode<synchronous>, transform_indices = @transform_5, window_bounds = array<i64: 128, 32>}, {transform_indices = @transform_6, window_bounds = array<i64: 32, 32>}]} {
    %c0 = arith.constant 0 : index
    %c0_0 = arith.constant 0 : index
    %0 = vector.load %arg4[%c0, %c0_0] : memref<32x480xf32, #tpu.memory_space<vmem>>, vector<32x32xf32>
    %c0_1 = arith.constant 0 : index
    %c32 = arith.constant 32 : index
    %1 = vector.load %arg4[%c0_1, %c32] : memref<32x480xf32, #tpu.memory_space<vmem>>, vector<32x192xf32>
    %c0_2 = arith.constant 0 : index
    %c224 = arith.constant 224 : index
    %2 = vector.load %arg4[%c0_2, %c224] : memref<32x480xf32, #tpu.memory_space<vmem>>, vector<32x96xf32>
    %c0_3 = arith.constant 0 : index
    %c320 = arith.constant 320 : index
    %3 = vector.load %arg4[%c0_3, %c320] : memref<32x480xf32, #tpu.memory_space<vmem>>, vector<32x32xf32>
    %c0_4 = arith.constant 0 : index
    %c352 = arith.constant 352 : index
    %4 = vector.load %arg4[%c0_4, %c352] : memref<32x480xf32, #tpu.memory_space<vmem>>, vector<32x128xf32>
    %c0_5 = arith.constant 0 : index
    %c0_6 = arith.constant 0 : index
    %5 = vector.load %arg5[%c0_5, %c0_6] : memref<1x480xf32, #tpu.memory_space<vmem>>, vector<1x192xf32>
    %c0_7 = arith.constant 0 : index
    %c192 = arith.constant 192 : index
    %6 = vector.load %arg5[%c0_7, %c192] : memref<1x480xf32, #tpu.memory_space<vmem>>, vector<1x96xf32>
    %c0_8 = arith.constant 0 : index
    %c288 = arith.constant 288 : index
    %7 = vector.load %arg5[%c0_8, %c288] : memref<1x480xf32, #tpu.memory_space<vmem>>, vector<1x32xf32>
    %c0_9 = arith.constant 0 : index
    %c320_10 = arith.constant 320 : index
    %8 = vector.load %arg5[%c0_9, %c320_10] : memref<1x480xf32, #tpu.memory_space<vmem>>, vector<1x128xf32>
    %c0_11 = arith.constant 0 : index
    %c448 = arith.constant 448 : index
    %9 = vector.load %arg5[%c0_11, %c448] : memref<1x480xf32, #tpu.memory_space<vmem>>, vector<1x32xf32>
    %c0_12 = arith.constant 0 : index
    %c0_13 = arith.constant 0 : index
    %10 = vector.load %arg1[%c0_12, %c0_13] : memref<32x32xf32, #tpu.memory_space<vmem>>, vector<32x32xf32>
    %cst = arith.constant dense<0.000000e+00> : vector<32x32xf32>
    %11 = tpu.matmul %10, %0, %cst {dimension_numbers = #tpu.dot_dimension_numbers<[1], [0], [0], [1], [0, 0, 1, 1], [], []>} : vector<32x32xf32>, vector<32x32xf32>, vector<32x32xf32> -> vector<32x32xf32>
    %c0_14 = arith.constant 0 : index
    %c0_15 = arith.constant 0 : index
    %12 = vector.load %arg3[%c0_14, %c0_15] : memref<32x32xf32, #tpu.memory_space<vmem>>, vector<32x32xf32>
    %13 = arith.addf %11, %12 : vector<32x32xf32>
    %c0_16 = arith.constant 0 : index
    %c0_17 = arith.constant 0 : index
    %14 = vector.load %arg2[%c0_16, %c0_17] : memref<32x32xf32, #tpu.memory_space<vmem>>, vector<32x32xf32>
    %15 = arith.negf %14 : vector<32x32xf32>
    %16 = math.exp %15 : vector<32x32xf32>
    %cst_18 = arith.constant 1.000000e+00 : f32
    %17 = vector.broadcast %cst_18 : f32 to vector<32x32xf32>
    %18 = arith.addf %17, %16 : vector<32x32xf32>
    %19 = arith.divf %17, %18 : vector<32x32xf32>
    %20 = arith.mulf %14, %19 : vector<32x32xf32>
    %cst_19 = arith.constant dense<0.000000e+00> : vector<32x192xf32>
    %21 = tpu.matmul %20, %1, %cst_19 {dimension_numbers = #tpu.dot_dimension_numbers<[1], [0], [0], [1], [0, 0, 1, 1], [], []>} : vector<32x32xf32>, vector<32x192xf32>, vector<32x192xf32> -> vector<32x192xf32>
    %22 = vector.broadcast %5 : vector<1x192xf32> to vector<32x192xf32>
    %23 = arith.addf %21, %22 : vector<32x192xf32>
    %24 = vector.extract_strided_slice %23 {offsets = [0, 0], sizes = [32, 32], strides = [1, 1]} : vector<32x192xf32> to vector<32x32xf32>
    %25 = vector.extract_strided_slice %23 {offsets = [0, 32], sizes = [32, 32], strides = [1, 1]} : vector<32x192xf32> to vector<32x32xf32>
    %26 = vector.extract_strided_slice %23 {offsets = [0, 64], sizes = [32, 32], strides = [1, 1]} : vector<32x192xf32> to vector<32x32xf32>
    %27 = vector.extract_strided_slice %23 {offsets = [0, 96], sizes = [32, 32], strides = [1, 1]} : vector<32x192xf32> to vector<32x32xf32>
    %28 = vector.extract_strided_slice %23 {offsets = [0, 128], sizes = [32, 32], strides = [1, 1]} : vector<32x192xf32> to vector<32x32xf32>
    %29 = vector.extract_strided_slice %23 {offsets = [0, 160], sizes = [32, 32], strides = [1, 1]} : vector<32x192xf32> to vector<32x32xf32>
    %cst_20 = arith.constant dense<0.000000e+00> : vector<32xf32>
    %30 = vector.multi_reduction <add>, %13, %cst_20 [1] : vector<32x32xf32> to vector<32xf32>
    %31 = vector.shape_cast %30 : vector<32xf32> to vector<32x1xf32>
    %cst_21 = arith.constant 3.200000e+01 : f32
    %32 = vector.broadcast %cst_21 : f32 to vector<32x1xf32>
    %33 = arith.divf %31, %32 : vector<32x1xf32>
    %34 = vector.broadcast %33 : vector<32x1xf32> to vector<32x32xf32>
    %35 = arith.subf %13, %34 : vector<32x32xf32>
    %36 = vector.broadcast %33 : vector<32x1xf32> to vector<32x32xf32>
    %37 = arith.subf %13, %36 : vector<32x32xf32>
    %38 = arith.mulf %35, %37 : vector<32x32xf32>
    %cst_22 = arith.constant dense<0.000000e+00> : vector<32xf32>
    %39 = vector.multi_reduction <add>, %38, %cst_22 [1] : vector<32x32xf32> to vector<32xf32>
    %40 = vector.shape_cast %39 : vector<32xf32> to vector<32x1xf32>
    %cst_23 = arith.constant 3.200000e+01 : f32
    %41 = vector.broadcast %cst_23 : f32 to vector<32x1xf32>
    %42 = arith.divf %40, %41 : vector<32x1xf32>
    %43 = vector.broadcast %33 : vector<32x1xf32> to vector<32x32xf32>
    %44 = arith.subf %13, %43 : vector<32x32xf32>
    %cst_24 = arith.constant 9.99999997E-7 : f32
    %45 = vector.broadcast %cst_24 : f32 to vector<32x1xf32>
    %46 = arith.addf %42, %45 : vector<32x1xf32>
    %47 = math.rsqrt %46 : vector<32x1xf32>
    %48 = vector.broadcast %47 : vector<32x1xf32> to vector<32x32xf32>
    %49 = arith.mulf %44, %48 : vector<32x32xf32>
    %cst_25 = arith.constant 1.000000e+00 : f32
    %50 = vector.broadcast %cst_25 : f32 to vector<32x32xf32>
    %51 = arith.addf %50, %25 : vector<32x32xf32>
    %52 = arith.mulf %49, %51 : vector<32x32xf32>
    %53 = arith.addf %52, %24 : vector<32x32xf32>
    %cst_26 = arith.constant dense<0.000000e+00> : vector<32x96xf32>
    %54 = tpu.matmul %53, %2, %cst_26 {dimension_numbers = #tpu.dot_dimension_numbers<[1], [0], [0], [1], [0, 0, 1, 1], [], []>} : vector<32x32xf32>, vector<32x96xf32>, vector<32x96xf32> -> vector<32x96xf32>
    %55 = vector.broadcast %6 : vector<1x96xf32> to vector<32x96xf32>
    %56 = arith.addf %54, %55 : vector<32x96xf32>
    %57 = vector.extract_strided_slice %56 {offsets = [0, 0], sizes = [32, 8], strides = [1, 1]} : vector<32x96xf32> to vector<32x8xf32>
    %58 = vector.shape_cast %57 : vector<32x8xf32> to vector<2x16x8xf32>
    %59 = vector.extract_strided_slice %56 {offsets = [0, 32], sizes = [32, 8], strides = [1, 1]} : vector<32x96xf32> to vector<32x8xf32>
    %60 = vector.shape_cast %59 : vector<32x8xf32> to vector<2x16x8xf32>
    %61 = vector.extract_strided_slice %56 {offsets = [0, 64], sizes = [32, 8], strides = [1, 1]} : vector<32x96xf32> to vector<32x8xf32>
    %62 = vector.shape_cast %61 : vector<32x8xf32> to vector<2x16x8xf32>
    "tpu.trace_start"() <{level = 10 : i32, message = "bqd,bkd->bqk"}> : () -> ()
    %cst_27 = arith.constant dense<0.000000e+00> : vector<2x16x16xf32>
    %63 = tpu.matmul %58, %60, %cst_27 {dimension_numbers = #tpu.dot_dimension_numbers<[2], [2], [1], [1], [0, 0, 0, 1, 1, 1], [0], [0]>} : vector<2x16x8xf32>, vector<2x16x8xf32>, vector<2x16x16xf32> -> vector<2x16x16xf32>
    "tpu.trace_stop"() : () -> ()
    %64 = vector.extract_strided_slice %56 {offsets = [0, 8], sizes = [32, 8], strides = [1, 1]} : vector<32x96xf32> to vector<32x8xf32>
    %65 = vector.shape_cast %64 : vector<32x8xf32> to vector<2x16x8xf32>
    %66 = vector.extract_strided_slice %56 {offsets = [0, 40], sizes = [32, 8], strides = [1, 1]} : vector<32x96xf32> to vector<32x8xf32>
    %67 = vector.shape_cast %66 : vector<32x8xf32> to vector<2x16x8xf32>
    %68 = vector.extract_strided_slice %56 {offsets = [0, 72], sizes = [32, 8], strides = [1, 1]} : vector<32x96xf32> to vector<32x8xf32>
    %69 = vector.shape_cast %68 : vector<32x8xf32> to vector<2x16x8xf32>
    "tpu.trace_start"() <{level = 10 : i32, message = "bqd,bkd->bqk"}> : () -> ()
    %cst_28 = arith.constant dense<0.000000e+00> : vector<2x16x16xf32>
    %70 = tpu.matmul %65, %67, %cst_28 {dimension_numbers = #tpu.dot_dimension_numbers<[2], [2], [1], [1], [0, 0, 0, 1, 1, 1], [0], [0]>} : vector<2x16x8xf32>, vector<2x16x8xf32>, vector<2x16x16xf32> -> vector<2x16x16xf32>
    "tpu.trace_stop"() : () -> ()
    %71 = vector.extract_strided_slice %56 {offsets = [0, 16], sizes = [32, 8], strides = [1, 1]} : vector<32x96xf32> to vector<32x8xf32>
    %72 = vector.shape_cast %71 : vector<32x8xf32> to vector<2x16x8xf32>
    %73 = vector.extract_strided_slice %56 {offsets = [0, 48], sizes = [32, 8], strides = [1, 1]} : vector<32x96xf32> to vector<32x8xf32>
    %74 = vector.shape_cast %73 : vector<32x8xf32> to vector<2x16x8xf32>
    %75 = vector.extract_strided_slice %56 {offsets = [0, 80], sizes = [32, 8], strides = [1, 1]} : vector<32x96xf32> to vector<32x8xf32>
    %76 = vector.shape_cast %75 : vector<32x8xf32> to vector<2x16x8xf32>
    "tpu.trace_start"() <{level = 10 : i32, message = "bqd,bkd->bqk"}> : () -> ()
    %cst_29 = arith.constant dense<0.000000e+00> : vector<2x16x16xf32>
    %77 = tpu.matmul %72, %74, %cst_29 {dimension_numbers = #tpu.dot_dimension_numbers<[2], [2], [1], [1], [0, 0, 0, 1, 1, 1], [0], [0]>} : vector<2x16x8xf32>, vector<2x16x8xf32>, vector<2x16x16xf32> -> vector<2x16x16xf32>
    "tpu.trace_stop"() : () -> ()
    %78 = vector.extract_strided_slice %56 {offsets = [0, 24], sizes = [32, 8], strides = [1, 1]} : vector<32x96xf32> to vector<32x8xf32>
    %79 = vector.shape_cast %78 : vector<32x8xf32> to vector<2x16x8xf32>
    %80 = vector.extract_strided_slice %56 {offsets = [0, 56], sizes = [32, 8], strides = [1, 1]} : vector<32x96xf32> to vector<32x8xf32>
    %81 = vector.shape_cast %80 : vector<32x8xf32> to vector<2x16x8xf32>
    %82 = vector.extract_strided_slice %56 {offsets = [0, 88], sizes = [32, 8], strides = [1, 1]} : vector<32x96xf32> to vector<32x8xf32>
    %83 = vector.shape_cast %82 : vector<32x8xf32> to vector<2x16x8xf32>
    "tpu.trace_start"() <{level = 10 : i32, message = "bqd,bkd->bqk"}> : () -> ()
    %cst_30 = arith.constant dense<0.000000e+00> : vector<2x16x16xf32>
    %84 = tpu.matmul %79, %81, %cst_30 {dimension_numbers = #tpu.dot_dimension_numbers<[2], [2], [1], [1], [0, 0, 0, 1, 1, 1], [0], [0]>} : vector<2x16x8xf32>, vector<2x16x8xf32>, vector<2x16x16xf32> -> vector<2x16x16xf32>
    "tpu.trace_stop"() : () -> ()
    %85 = tpu.concatenate %63, %70, %77, %84 in 1 : vector<2x16x16xf32>, vector<2x16x16xf32>, vector<2x16x16xf32>, vector<2x16x16xf32> -> vector<2x64x16xf32>
    %cst_31 = arith.constant dense<0xFF800000> : vector<2x64xf32>
    %86 = vector.multi_reduction <maximumf>, %85, %cst_31 [2] : vector<2x64x16xf32> to vector<2x64xf32>
    %87 = vector.shape_cast %86 : vector<2x64xf32> to vector<2x64x1xf32>
    %88 = vector.broadcast %87 : vector<2x64x1xf32> to vector<2x64x16xf32>
    %89 = arith.subf %85, %88 : vector<2x64x16xf32>
    %90 = math.exp %89 : vector<2x64x16xf32>
    %cst_32 = arith.constant dense<0.000000e+00> : vector<2x64xf32>
    %91 = vector.multi_reduction <add>, %90, %cst_32 [2] : vector<2x64x16xf32> to vector<2x64xf32>
    %92 = vector.shape_cast %91 : vector<2x64xf32> to vector<2x64x1xf32>
    %93 = vector.broadcast %92 : vector<2x64x1xf32> to vector<2x64x16xf32>
    %94 = arith.divf %90, %93 : vector<2x64x16xf32>
    %95 = vector.extract_strided_slice %94 {offsets = [0, 0, 0], sizes = [2, 16, 16], strides = [1, 1, 1]} : vector<2x64x16xf32> to vector<2x16x16xf32>
    "tpu.trace_start"() <{level = 10 : i32, message = "bqk,bkd->bqd"}> : () -> ()
    %cst_33 = arith.constant dense<0.000000e+00> : vector<2x16x8xf32>
    %96 = tpu.matmul %95, %62, %cst_33 {dimension_numbers = #tpu.dot_dimension_numbers<[2], [1], [1], [2], [0, 0, 0, 1, 1, 2], [0], [0]>} : vector<2x16x16xf32>, vector<2x16x8xf32>, vector<2x16x8xf32> -> vector<2x16x8xf32>
    "tpu.trace_stop"() : () -> ()
    %97 = vector.shape_cast %96 : vector<2x16x8xf32> to vector<32x8xf32>
    %98 = vector.extract_strided_slice %94 {offsets = [0, 16, 0], sizes = [2, 16, 16], strides = [1, 1, 1]} : vector<2x64x16xf32> to vector<2x16x16xf32>
    "tpu.trace_start"() <{level = 10 : i32, message = "bqk,bkd->bqd"}> : () -> ()
    %cst_34 = arith.constant dense<0.000000e+00> : vector<2x16x8xf32>
    %99 = tpu.matmul %98, %69, %cst_34 {dimension_numbers = #tpu.dot_dimension_numbers<[2], [1], [1], [2], [0, 0, 0, 1, 1, 2], [0], [0]>} : vector<2x16x16xf32>, vector<2x16x8xf32>, vector<2x16x8xf32> -> vector<2x16x8xf32>
    "tpu.trace_stop"() : () -> ()
    %100 = vector.shape_cast %99 : vector<2x16x8xf32> to vector<32x8xf32>
    %101 = vector.extract_strided_slice %94 {offsets = [0, 32, 0], sizes = [2, 16, 16], strides = [1, 1, 1]} : vector<2x64x16xf32> to vector<2x16x16xf32>
    "tpu.trace_start"() <{level = 10 : i32, message = "bqk,bkd->bqd"}> : () -> ()
    %cst_35 = arith.constant dense<0.000000e+00> : vector<2x16x8xf32>
    %102 = tpu.matmul %101, %76, %cst_35 {dimension_numbers = #tpu.dot_dimension_numbers<[2], [1], [1], [2], [0, 0, 0, 1, 1, 2], [0], [0]>} : vector<2x16x16xf32>, vector<2x16x8xf32>, vector<2x16x8xf32> -> vector<2x16x8xf32>
    "tpu.trace_stop"() : () -> ()
    %103 = vector.shape_cast %102 : vector<2x16x8xf32> to vector<32x8xf32>
    %104 = vector.extract_strided_slice %94 {offsets = [0, 48, 0], sizes = [2, 16, 16], strides = [1, 1, 1]} : vector<2x64x16xf32> to vector<2x16x16xf32>
    "tpu.trace_start"() <{level = 10 : i32, message = "bqk,bkd->bqd"}> : () -> ()
    %cst_36 = arith.constant dense<0.000000e+00> : vector<2x16x8xf32>
    %105 = tpu.matmul %104, %83, %cst_36 {dimension_numbers = #tpu.dot_dimension_numbers<[2], [1], [1], [2], [0, 0, 0, 1, 1, 2], [0], [0]>} : vector<2x16x16xf32>, vector<2x16x8xf32>, vector<2x16x8xf32> -> vector<2x16x8xf32>
    "tpu.trace_stop"() : () -> ()
    %106 = vector.shape_cast %105 : vector<2x16x8xf32> to vector<32x8xf32>
    %107 = tpu.concatenate %97, %100, %103, %106 in 1 : vector<32x8xf32>, vector<32x8xf32>, vector<32x8xf32>, vector<32x8xf32> -> vector<32x32xf32>
    %cst_37 = arith.constant dense<0.000000e+00> : vector<32x32xf32>
    %108 = tpu.matmul %107, %3, %cst_37 {dimension_numbers = #tpu.dot_dimension_numbers<[1], [0], [0], [1], [0, 0, 1, 1], [], []>} : vector<32x32xf32>, vector<32x32xf32>, vector<32x32xf32> -> vector<32x32xf32>
    %109 = vector.broadcast %7 : vector<1x32xf32> to vector<32x32xf32>
    %110 = arith.addf %108, %109 : vector<32x32xf32>
    %111 = arith.mulf %26, %110 : vector<32x32xf32>
    %112 = arith.addf %13, %111 : vector<32x32xf32>
    %cst_38 = arith.constant dense<0.000000e+00> : vector<32xf32>
    %113 = vector.multi_reduction <add>, %112, %cst_38 [1] : vector<32x32xf32> to vector<32xf32>
    %114 = vector.shape_cast %113 : vector<32xf32> to vector<32x1xf32>
    %cst_39 = arith.constant 3.200000e+01 : f32
    %115 = vector.broadcast %cst_39 : f32 to vector<32x1xf32>
    %116 = arith.divf %114, %115 : vector<32x1xf32>
    %117 = vector.broadcast %116 : vector<32x1xf32> to vector<32x32xf32>
    %118 = arith.subf %112, %117 : vector<32x32xf32>
    %119 = vector.broadcast %116 : vector<32x1xf32> to vector<32x32xf32>
    %120 = arith.subf %112, %119 : vector<32x32xf32>
    %121 = arith.mulf %118, %120 : vector<32x32xf32>
    %cst_40 = arith.constant dense<0.000000e+00> : vector<32xf32>
    %122 = vector.multi_reduction <add>, %121, %cst_40 [1] : vector<32x32xf32> to vector<32xf32>
    %123 = vector.shape_cast %122 : vector<32xf32> to vector<32x1xf32>
    %cst_41 = arith.constant 3.200000e+01 : f32
    %124 = vector.broadcast %cst_41 : f32 to vector<32x1xf32>
    %125 = arith.divf %123, %124 : vector<32x1xf32>
    %126 = vector.broadcast %116 : vector<32x1xf32> to vector<32x32xf32>
    %127 = arith.subf %112, %126 : vector<32x32xf32>
    %cst_42 = arith.constant 9.99999997E-7 : f32
    %128 = vector.broadcast %cst_42 : f32 to vector<32x1xf32>
    %129 = arith.addf %125, %128 : vector<32x1xf32>
    %130 = math.rsqrt %129 : vector<32x1xf32>
    %131 = vector.broadcast %130 : vector<32x1xf32> to vector<32x32xf32>
    %132 = arith.mulf %127, %131 : vector<32x32xf32>
    %cst_43 = arith.constant 1.000000e+00 : f32
    %133 = vector.broadcast %cst_43 : f32 to vector<32x32xf32>
    %134 = arith.addf %133, %28 : vector<32x32xf32>
    %135 = arith.mulf %132, %134 : vector<32x32xf32>
    %136 = arith.addf %135, %27 : vector<32x32xf32>
    %cst_44 = arith.constant dense<0.000000e+00> : vector<32x128xf32>
    %137 = tpu.matmul %136, %4, %cst_44 {dimension_numbers = #tpu.dot_dimension_numbers<[1], [0], [0], [1], [0, 0, 1, 1], [], []>} : vector<32x32xf32>, vector<32x128xf32>, vector<32x128xf32> -> vector<32x128xf32>
    %138 = vector.broadcast %8 : vector<1x128xf32> to vector<32x128xf32>
    %139 = arith.addf %137, %138 : vector<32x128xf32>
    %140 = arith.mulf %139, %139 : vector<32x128xf32>
    %141 = arith.mulf %139, %140 : vector<32x128xf32>
    %cst_45 = arith.constant 4.471500e-02 : f32
    %142 = vector.broadcast %cst_45 : f32 to vector<32x128xf32>
    %143 = arith.mulf %142, %141 : vector<32x128xf32>
    %144 = arith.addf %139, %143 : vector<32x128xf32>
    %cst_46 = arith.constant 0.797884583 : f32
    %145 = vector.broadcast %cst_46 : f32 to vector<32x128xf32>
    %146 = arith.mulf %145, %144 : vector<32x128xf32>
    %147 = math.tanh %146 : vector<32x128xf32>
    %cst_47 = arith.constant 1.000000e+00 : f32
    %148 = vector.broadcast %cst_47 : f32 to vector<32x128xf32>
    %149 = arith.addf %148, %147 : vector<32x128xf32>
    %cst_48 = arith.constant 5.000000e-01 : f32
    %150 = vector.broadcast %cst_48 : f32 to vector<32x128xf32>
    %151 = arith.mulf %150, %149 : vector<32x128xf32>
    %152 = arith.mulf %139, %151 : vector<32x128xf32>
    %c0_49 = arith.constant 0 : index
    %c0_50 = arith.constant 0 : index
    %153 = vector.load %arg6[%c0_49, %c0_50] : memref<128x32xf32, #tpu.memory_space<vmem>>, vector<128x32xf32>
    %cst_51 = arith.constant dense<0.000000e+00> : vector<32x32xf32>
    %154 = tpu.matmul %152, %153, %cst_51 {dimension_numbers = #tpu.dot_dimension_numbers<[1], [0], [0], [1], [0, 0, 1, 1], [], []>} : vector<32x128xf32>, vector<128x32xf32>, vector<32x32xf32> -> vector<32x32xf32>
    %155 = vector.broadcast %9 : vector<1x32xf32> to vector<32x32xf32>
    %156 = arith.addf %154, %155 : vector<32x32xf32>
    %157 = arith.mulf %29, %156 : vector<32x32xf32>
    %158 = arith.addf %112, %157 : vector<32x32xf32>
    %c0_52 = arith.constant 0 : index
    %c0_53 = arith.constant 0 : index
    %159 = vector.load %arg7[%c0_52, %c0_53] : memref<32x32xf32, #tpu.memory_space<vmem>>, vector<32x32xf32>
    tpu.vector_store %arg7[%c0_52, %c0_53], %158 {strides = array<i32>} : memref<32x32xf32, #tpu.memory_space<vmem>>, vector<32x32xf32>,
    return
  }
  func.func @transform_0(%arg0: i32) -> (i32, i32) {
    %c0_i32 = arith.constant 0 : i32
    %c0_i32_0 = arith.constant 0 : i32
    return %arg0, %c0_i32 : i32, i32
  }
  func.func @transform_1(%arg0: i32) -> (i32, i32) {
    %c0_i32 = arith.constant 0 : i32
    %c0_i32_0 = arith.constant 0 : i32
    return %arg0, %c0_i32 : i32, i32
  }
  func.func @transform_2(%arg0: i32) -> (i32, i32) {
    %c0_i32 = arith.constant 0 : i32
    %c0_i32_0 = arith.constant 0 : i32
    %c0_i32_1 = arith.constant 0 : i32
    return %c0_i32, %c0_i32_0 : i32, i32
  }
  func.func @transform_3(%arg0: i32) -> (i32, i32) {
    %c0_i32 = arith.constant 0 : i32
    %c0_i32_0 = arith.constant 0 : i32
    %c0_i32_1 = arith.constant 0 : i32
    return %c0_i32, %c0_i32_0 : i32, i32
  }
  func.func @transform_4(%arg0: i32) -> (i32, i32) {
    %c0_i32 = arith.constant 0 : i32
    %c0_i32_0 = arith.constant 0 : i32
    %c0_i32_1 = arith.constant 0 : i32
    return %c0_i32, %c0_i32_0 : i32, i32
  }
  func.func @transform_5(%arg0: i32) -> (i32, i32) {
    %c0_i32 = arith.constant 0 : i32
    %c0_i32_0 = arith.constant 0 : i32
    %c0_i32_1 = arith.constant 0 : i32
    return %c0_i32, %c0_i32_0 : i32, i32
  }
  func.func @transform_6(%arg0: i32) -> (i32, i32) {
    %c0_i32 = arith.constant 0 : i32
    %c0_i32_0 = arith.constant 0 : i32
    return %arg0, %c0_i32 : i32, i32
  }
}

</mosaic_0001>

<bundles_post_ra>
// kernel: mul.9
= control target key start
LH: loop header
LB: loop body
LE: loop exit
PB: predicated region body
PF: predicated region fallthrough
CT: control target
= control target key end

     0   :  { %s34_s0 = inlined_call_operand.vmem [shape: f32[1,96], index: 0, kind: input, shape index: {}]   ;;  %s35_s1 = inlined_call_operand.vmem [shape: f32[1,96], index: 1, kind: input, shape index: {}]   ;;  %s36_s2 = inlined_call_operand.vmem [shape: f32[1,96], index: 2, kind: output, shape index: {}]  }
   0x1   :  { %v3_v0 = vld [vmem:[%s34_s0] sm:$0x1] }
   0x2   :  { %v4_v1 = vld [vmem:[%s35_s1] sm:$0x1] }
   0x3   :  { %v7_v2 = vmul.f32 %v4_v1, %v3_v0 }
   0x5   :  { %9 = vst [vmem:[%s36_s2] sm:$0x1] %v7_v2 }

// kernel: dit_block_patch.1
= control target key start
LH: loop header
LB: loop body
LE: loop exit
PB: predicated region body
PF: predicated region fallthrough
CT: control target
= control target key end

     0   :  { %vm52_vm0 = vcmask 261120   ;;  %s3587_s11 = smov 96   ;;  %v3588_v18 = vmov 0.0   ;;  %vm217_vm1 = vcmask 785408   ;;  %s3589_s16 = smov 32   ;;  %vm453_vm2 = vcmask 523264   ;;  %s4369_s3 = inlined_call_operand.vmem [shape: f32[32,480], index: 3, kind: input, shape index: {}]   ;;  %s4370_s0 = inlined_call_operand.vmem [shape: f32[32,32], index: 0, kind: input, shape index: {}]   ;;  %s4371_s1 = inlined_call_operand.vmem [shape: f32[32,32], index: 1, kind: input, shape index: {}]   ;;  %s4372_s2 = inlined_call_operand.vmem [shape: f32[32,32], index: 2, kind: input, shape index: {}]   ;;  %s4373_s4 = inlined_call_operand.vmem [shape: f32[1,480], index: 4, kind: input, shape index: {}]   ;;  %s4374_s5 = inlined_call_operand.vmem [shape: f32[128,32], index: 5, kind: input, shape index: {}]   ;;  %s4375_s6 = inlined_call_operand.vmem [shape: f32[32,32], index: 6, kind: output, shape index: {}]  }
   0x1   :  { %v3641_v0 = vld [vmem:[%s4369_s3 + $0x48] sm:$0xff]  ;;  %v25_v1 = vld [vmem:[%s4369_s3 + $0x40] sm:$0xff]  ;;  %v46_v16 = vld [vmem:[%s4370_s0 + $0x10] sm:$0xff]  ;;  %s3590_s25 = smov 64   ;;  %vm559_vm3 = vcmask 64512   ;;  %s3591_s26 = smov 88  }
   0x2   :  { %v26_v2 = vld [vmem:[%s4369_s3 + $0x60] sm:$0xff]  ;;  %v3348_v3 = vpack.i.bf16 %v3641_v0, %v25_v1  ;;  %v3653_v4 = vld [vmem:[%s4369_s3 + $0x8] sm:$0xff]  ;;  %v47_v17 = vld [vmem:[%s4370_s0 + $0x18] sm:$0xff]  ;;  %s3592_s27 = smov 120   ;;  %s3594_s28 = smov 72   ;;  %vm1278_vm5 = vcmask 130048  }
   0x3   :  { %v23_v5 = vld [vmem:[%s4369_s3] sm:$0xff]  ;;  %v3664_v7 = vld [vmem:[%s4369_s3 + $0x28] sm:$0xff]  ;;  %v3174_v8 = vpack.c.bf16 %v26_v2, %v25_v1  ;;  %v152_v23 = vld [vmem:[%s4371_s1 + $0x10] sm:$0xff]  ;;  %s3596_s29 = smov 104   ;;  %s3597_s30 = smov 56   ;;  %vm2207_vm6 = vcmask 195584  }
   0x4   :  { %v24_v6 = vld [vmem:[%s4369_s3 + $0x20] sm:$0xff]  ;;  %3349 = vrot.lane.b32.xlu1 %v3348_v3, %s3587_s11  ;;  %v3338_v9 = vpack.i.bf16 %v3653_v4, %v23_v5  ;;  %v3671_v11 = vld [vmem:[%s4369_s3 + $0x68] sm:$0xff]  ;;  %v2780_v24 = vmul.f32 -1.442695, %v152_v23  ;;  %v153_v25 = vld [vmem:[%s4371_s1 + $0x18] sm:$0xff]  ;;  %s3598_s7 = smov 48  }
   0x5   :  { %v3170_v10 = vpack.c.bf16 %v24_v6, %v23_v5  ;;  %v44_v12 = vld [vmem:[%s4370_s0] sm:$0xff]  ;;  %v3353_v13 = vpack.i.bf16 %v3671_v11, %v26_v2  ;;  %v3343_v14 = vpack.i.bf16 %v3664_v7, %v24_v6  ;;  %v45_v15 = vld [vmem:[%s4370_s0 + $0x8] sm:$0xff]  ;;  %v2781_v26 = vmul.f32 -1.442695, %v153_v25  ;;  %s3593_s0 = smov 80   ;;  %vm3905_vm4 = vmpackc.low %vm559_vm3, %vm559_vm3  ;;  %s3599_s8 = smov 40  }
   0x6   :  { %2972 = vmatprep.mubr.msk.f32.mxu1 %vm52_vm0, %v44_v12  ;;  %3339 = vrot.lane.b32.xlu0 %v3338_v9, %s3587_s11  ;;  %v150_v19 = vld [vmem:[%s4371_s1] sm:$0xff]  ;;  %v151_v21 = vld [vmem:[%s4371_s1 + $0x8] sm:$0xff]  ;;  %v51_v9 = vld [vmem:[%s4372_s2 + $0x18] sm:$0xff]  ;;  %s3595_s1 = smov 112   ;;  %s3600_s18 = smov 8  }
   0x7   :  { %3171 = vmatprep.subr.bf16.mxu1 %v3170_v10  ;;  %v2778_v20 = vmul.f32 -1.442695, %v150_v19  ;;  %v2779_v22 = vmul.f32 -1.442695, %v151_v21  ;;  %v49_v63 = vld [vmem:[%s4372_s2 + $0x8] sm:$0xff]  ;;  %v48_v1 = vld [vmem:[%s4372_s2] sm:$0xff] }
   0x8   :  { %3173 = vmatpush3.bf16.msra.mxu1 %v3170_v10  ;;  %3354 = vrot.lane.b32.xlu1 %v3353_v13, %s3587_s11  ;;  %v50_v10 = vld [vmem:[%s4372_s2 + $0x10] sm:$0xff]  ;;  %s3601_s19 = smov 16   ;;  %s3602_s20 = smov 24  }
   0x9   :  { %3175 = vmatprep.subr.bf16.mxu1 %v3174_v8  ;;  %3478 = vpow2.f32 %v2778_v20 }
   0xa   :  { %3344 = vrot.lane.b32.xlu0 %v3343_v14, %s3587_s11  ;;  %3480 = vpow2.f32 %v2779_v22 }
   0xb   :  { %3482 = vpow2.f32 %v2780_v24 }
   0xc   :  { %3177 = vmatpush3.bf16.msra.mxu1 %v3174_v8  ;;  %3484 = vpow2.f32 %v2781_v26 }
   0xf   :  { %2973 = vmatmul.mubr.msk.f32.vlgmr.msra.gmra.mrb[0].mxu1 %vm52_vm0, %v45_v15 }
  0x10   :  { %2975 = vmatprep.mubr.msk.f32.mxu1 %vm52_vm0, %v46_v16 }
  0x13   :  { %2976 = vmatmul.mubr.msk.f32.gmra.mrb[2].mxu1 %vm52_vm0, %v47_v17  ;;  %v3479_v27 = vpop.eup %3478 }
  0x14   :  { %306 = vmatprep.mubr.f32.mxu1 %v3588_v18  ;;  %v166_v28 = vadd.f32 1.0, %v3479_v27  ;;  %v3481_v29 = vpop.eup %3480 }
  0x15   :  { %v167_v32 = vadd.f32 1.0, %v3481_v29  ;;  %v3483_v33 = vpop.eup %3482 }
  0x16   :  { %3486 = vrcp.f32 %v166_v28  ;;  %v168_v40 = vadd.f32 1.0, %v3483_v33  ;;  %v3485_v41 = vpop.eup %3484 }
  0x17   :  { %3488 = vrcp.f32 %v167_v32  ;;  %v169_v50 = vadd.f32 1.0, %v3485_v41 }
  0x18   :  { %3490 = vrcp.f32 %v168_v40 }
  0x19   :  { %3492 = vrcp.f32 %v169_v50 }
  0x20   :  { %v3487_v54 = vpop.eup %3486 }
  0x21   :  { %v178_v56 = vmul.f32 %v3487_v54, %v150_v19  ;;  %v3489_v57 = vpop.eup %3488  ;;  %v31_v19 = vld [vmem:[%s4369_s3 + $0x10] sm:$0xff] }
  0x22   :  { %v179_v58 = vmul.f32 %v3489_v57, %v151_v21  ;;  %v3491_v59 = vpop.eup %3490  ;;  %v3358_v20 = vpack.i.bf16 %v31_v19, %v3653_v4  ;;  %v33_v21 = vld [vmem:[%s4369_s3 + $0x50] sm:$0xff] }
  0x23   :  { %v180_v60 = vmul.f32 %v3491_v59, %v152_v23  ;;  %v3493_v61 = vpop.eup %3492  ;;  %v3368_v22 = vpack.i.bf16 %v33_v21, %v3641_v0  ;;  %v34_v23 = vld [vmem:[%s4369_s3 + $0x70] sm:$0xff]  ;;  %v183_v0 = vlaneseq }
  0x24   :  { %v181_v62 = vmul.f32 %v3493_v61, %v153_v25  ;;  %v3373_v24 = vpack.i.bf16 %v34_v23, %v3671_v11  ;;  %v32_v4 = vld [vmem:[%s4369_s3 + $0x30] sm:$0xff]  ;;  %v39_v11 = vld [vmem:[%s4373_s4] sm:$0x3] }
  0x25   :  { %v3363_v25 = vpack.i.bf16 %v32_v4, %v3664_v7  ;;  %v3766_v26 = vshrl.u32 %v183_v0, 7  ;;  %v40_v0 = vld [vmem:[%s4373_s4 + $0x1] sm:$0x3] }
  0x27   :  { %v3769_v27 = vsub.s32 0, %v3766_v26 }
  0x29   :  { %v186_v28 = vrot.slane %v39_v11, %v3769_v27 }
  0x76   :  { %v3350_v30 = vpop.permute.xlu1 %3349 }
  0x77   :  { %v3352_v37 = vunpack.i.h.bf16 %v3350_v30  ;;  %v3351_v38 = vunpack.i.l.bf16 %v3350_v30 }
  0x78   :  { %v3340_v31 = vpop.permute.xlu0 %3339 }
  0x79   :  { %v3342_v35 = vunpack.i.h.bf16 %v3340_v31  ;;  %v3341_v36 = vunpack.i.l.bf16 %v3340_v31  ;;  %v220_v51 = vsel %vm217_vm1, %v3351_v38, %v3352_v37 }
  0x7a   :  { %v3355_v34 = vpop.permute.xlu1 %3354 }
  0x7b   :  { %v3357_v42 = vunpack.i.h.bf16 %v3355_v34  ;;  %v3356_v43 = vunpack.i.l.bf16 %v3355_v34  ;;  %v218_v46 = vsel %vm217_vm1, %v3341_v36, %v3342_v35 }
  0x7c   :  { %v3345_v39 = vpop.permute.xlu0 %3344 }
  0x7d   :  { %v3347_v44 = vunpack.i.h.bf16 %v3345_v39  ;;  %v3346_v45 = vunpack.i.l.bf16 %v3345_v39  ;;  %v221_v52 = vsel %vm217_vm1, %v3356_v43, %v3357_v42  ;;  %v3182_v53 = vpack.c.bf16 %v3357_v42, %v3352_v37 }
  0x7e   :  { %v3184_v55 = vpack.c.bf16 %v221_v52, %v220_v51 }
  0x7f   :  { %v219_v47 = vsel %vm217_vm1, %v3346_v45, %v3347_v44  ;;  %v3178_v48 = vpack.c.bf16 %v3347_v44, %v3342_v35 }
  0x80   :  { %v3180_v49 = vpack.c.bf16 %v219_v47, %v218_v46 }
  0x81   :  { %3179 = vmatprep.subr.bf16.mxu1 %v3178_v48 }
  0x82   :  { %3181 = vmatpush1.bf16.msra.mxu1 %v3180_v49 }
  0x83   :  { %3183 = vmatprep.subr.bf16.mxu1 %v3182_v53 }
  0x86   :  { %3185 = vmatpush1.bf16.msra.mxu1 %v3184_v55 }
  0x89   :  { %2782 = vmatmul.mubr.msk.f32.vlgmr.msra.gmra.mrb[4].mxu1 %vm52_vm0, %v178_v56 }
  0x8a   :  { %312 = vmatprep.mubr.f32.mxu1 %v3588_v18 }
  0x8d   :  { %2783 = vmatmul.mubr.msk.f32.gmra.mrb[6].mxu1 %vm52_vm0, %v179_v58 }
  0x8e   :  { %318 = vmatprep.mubr.f32.mxu1 %v3588_v18 }
  0x91   :  { %2784 = vmatmul.mubr.msk.f32.gmra.mrb[8].mxu1 %vm52_vm0, %v180_v60 }
  0x92   :  { %324 = vmatprep.mubr.f32.mxu1 %v3588_v18 }
  0x95   :  { %2785 = vmatmul.mubr.msk.f32.gmra.mrb[10].mxu1 %vm52_vm0, %v181_v62 }
  0xe2   :  { %v2974_v2 = vpop.f32.mrb[0].mxu1 }
  0xe3   :  { %v3724_v3 = vadd.f32 %v2974_v2, %v49_v63  ;;  %v131_v5 = vpop.f32.mrb[1].mxu1 }
  0xe4   :  { %v3726_v6 = vadd.f32 %v131_v5, %v48_v1 }
  0xe5   :  { %v334_v8 = vsel %vm52_vm0, %v3724_v3, 0.0 }
  0xe6   :  { %335 = vadd.xlane.f32.xlu1 %v334_v8  ;;  %v2977_v12 = vpop.f32.mrb[2].mxu1  ;;  %v331_v13 = vsel %vm52_vm0, %v3726_v6, 0.0 }
  0xe7   :  { %v141_v14 = vpop.f32.mrb[3].mxu1  ;;  %332 = vadd.xlane.f32.xlu0 %v331_v13  ;;  %v3738_v15 = vadd.f32 %v2977_v12, %v51_v9 }
  0xe8   :  { %v3740_v16 = vadd.f32 %v141_v14, %v50_v10 }
  0xe9   :  { %v340_v18 = vsel %vm52_vm0, %v3738_v15, 0.0 }
  0xea   :  { %v337_v17 = vsel %vm52_vm0, %v3740_v16, 0.0 }
  0xeb   :  { %338 = vadd.xlane.f32.xlu0 %v337_v17 }
  0xef   :  { %341 = vadd.xlane.f32.xlu0 %v340_v18 }
  0xf7   :  { %3359 = vrot.lane.b32.xlu1 %v3358_v20, %s3589_s16 }
  0xfb   :  { %3369 = vrot.lane.b32.xlu1 %v3368_v22, %s3589_s16 }
  0xff   :  { %3374 = vrot.lane.b32.xlu1 %v3373_v24, %s3589_s16 }
 0x105   :  { %3364 = vrot.lane.b32.xlu0 %v3363_v25, %s3589_s16  ;;  %v3848_v25 = vsub.s32 1, %v3766_v26 }
 0x107   :  { %v420_v11 = vrot.slane %v40_v0, %v3848_v25 }
 0x15c   :  { %v308_v29 = vpop.f32.mrb[4].mxu1 }
 0x15d   :  { %v3775_v30 = vadd.f32 %v308_v29, %v186_v28  ;;  %v3777_v31 = vpop.f32.mrb[5].mxu1 }
 0x15f   :  { %v384_v7 = vadd.f32 1.0, %v3775_v30 }
 0x160   :  { %v314_v32 = vpop.f32.mrb[6].mxu1 }
 0x161   :  { %v3780_v33 = vadd.f32 %v314_v32, %v186_v28  ;;  %v3782_v34 = vpop.f32.mrb[7].mxu1  ;;  %392 = vrot.lane.b32.xlu0 %v384_v7, %s3587_s11 }
 0x163   :  { %v385_v35 = vadd.f32 1.0, %v3780_v33 }
 0x164   :  { %v320_v36 = vpop.f32.mrb[8].mxu1 }
 0x165   :  { %394 = vrot.lane.b32.xlu1 %v385_v35, %s3587_s11  ;;  %v3787_v37 = vpop.f32.mrb[9].mxu1  ;;  %v3839_v22 = vadd.f32 %v320_v36, %v186_v28 }
 0x167   :  { %v386_v24 = vadd.f32 1.0, %v3839_v22 }
 0x168   :  { %v326_v38 = vpop.f32.mrb[10].mxu1 }
 0x169   :  { %v3789_v39 = vpop.f32.mrb[11].mxu1  ;;  %v3841_v23 = vadd.f32 %v326_v38, %v186_v28  ;;  %v416_v28 = vrot.slane %v40_v0, %v3769_v27 }
 0x16b   :  { %v387_v4 = vadd.f32 1.0, %v3841_v23 }
 0x173   :  { %v336_v40 = vpop.xlane.xlu1 %335 }
 0x174   :  { %v345_v41 = vmul.f32 0.03125, %v336_v40  ;;  %v333_v42 = vpop.xlane.xlu0 %332 }
 0x175   :  { %v344_v46 = vmul.f32 0.03125, %v333_v42 }
 0x176   :  { %v3794_v44 = vsub.f32 %v3724_v3, %v345_v41 }
 0x177   :  { %v3791_v43 = vpop.permute.xlu1 %3359  ;;  %v3805_v55 = vsub.f32 %v3726_v6, %v344_v46 }
 0x178   :  { %v339_v45 = vpop.xlane.xlu0 %338  ;;  %v353_v49 = vmul.f32 %v3794_v44, %v3794_v44  ;;  %v3362_v50 = vunpack.i.h.bf16 %v3791_v43  ;;  %v3361_v51 = vunpack.i.l.bf16 %v3791_v43 }
 0x179   :  { %v346_v56 = vmul.f32 0.03125, %v339_v45  ;;  %v352_v18 = vmul.f32 %v3805_v55, %v3805_v55 }
 0x17a   :  { %v359_v59 = vsel %vm52_vm0, %v353_v49, 0.0  ;;  %v441_v63 = vsel %vm52_vm0, %v3361_v51, %v3362_v50 }
 0x17b   :  { %v3796_v47 = vpop.permute.xlu1 %3369  ;;  %v350_v17 = vsub.f32 %v3740_v16, %v346_v56  ;;  %v356_v19 = vsel %vm52_vm0, %v352_v18, 0.0 }
 0x17c   :  { %v342_v48 = vpop.xlane.xlu0 %341  ;;  %v3372_v53 = vunpack.i.h.bf16 %v3796_v47  ;;  %v3371_v54 = vunpack.i.l.bf16 %v3796_v47  ;;  %v42_v47 = vld [vmem:[%s4373_s4 + $0x2] sm:$0x3] }
 0x17d   :  { %v347_v52 = vmul.f32 0.03125, %v342_v48  ;;  %v354_v20 = vmul.f32 %v350_v17, %v350_v17 }
 0x17e   :  { %v443_v8 = vsel %vm52_vm0, %v3371_v54, %v3372_v53 }
 0x17f   :  { %v3808_v57 = vsub.f32 %v3738_v15, %v347_v52  ;;  %v3810_v58 = vpop.permute.xlu1 %3374  ;;  %v362_v21 = vsel %vm52_vm0, %v354_v20, 0.0 }
 0x180   :  { %v3813_v60 = vpop.permute.xlu0 %3364  ;;  %v3377_v61 = vunpack.i.h.bf16 %v3810_v58  ;;  %v3376_v62 = vunpack.i.l.bf16 %v3810_v58  ;;  %360 = vadd.xlane.f32.xlu0 %v359_v59 }
 0x181   :  { %v355_v1 = vmul.f32 %v3808_v57, %v3808_v57  ;;  %v3367_v2 = vunpack.i.h.bf16 %v3813_v60  ;;  %v3366_v5 = vunpack.i.l.bf16 %v3813_v60 }
 0x182   :  { %v444_v9 = vsel %vm52_vm0, %v3376_v62, %v3377_v61 }
 0x183   :  { %v365_v10 = vsel %vm52_vm0, %v355_v1, 0.0  ;;  %v442_v12 = vsel %vm52_vm0, %v3366_v5, %v3367_v2  ;;  %v3190_v14 = vpack.c.bf16 %v444_v9, %v443_v8 }
 0x184   :  { %v3186_v13 = vpack.c.bf16 %v442_v12, %v441_v63  ;;  %366 = vadd.xlane.f32.xlu0 %v365_v10 }
 0x186   :  { %3187 = vmatprep.subr.bf16.mxu1 %v3186_v13 }
 0x187   :  { %3189 = vmatpush3.bf16.msra.mxu1 %v3186_v13 }
 0x188   :  { %3191 = vmatprep.subr.bf16.mxu1 %v3190_v14 }
 0x189   :  { %357 = vadd.xlane.f32.xlu1 %v356_v19 }
 0x18b   :  { %3193 = vmatpush3.bf16.msra.mxu1 %v3190_v14 }
 0x18d   :  { %363 = vadd.xlane.f32.xlu1 %v362_v21 }
 0x19a   :  { %396 = vrot.lane.b32.xlu0 %v386_v24, %s3587_s11 }
 0x19e   :  { %398 = vrot.lane.b32.xlu1 %v387_v4, %s3587_s11  ;;  %449 = vrot.lane.b32.xlu0 %v416_v28, %s3590_s25 }
 0x1a2   :  { %451 = vrot.lane.b32.xlu1 %v420_v11, %s3590_s25 }
 0x1d3   :  { %v393_v29 = vpop.permute.xlu0 %392 }
 0x1d7   :  { %v395_v36 = vpop.permute.xlu1 %394 }
 0x20d   :  { %v361_v7 = vpop.xlane.xlu0 %360 }
 0x20e   :  { %v369_v32 = vmul.f32 0.03125, %v361_v7 }
 0x210   :  { %v373_v26 = vadd.f32 1e-06, %v369_v32 }
 0x211   :  { %v367_v35 = vpop.xlane.xlu0 %366 }
 0x212   :  { %v371_v38 = vmul.f32 0.03125, %v367_v35  ;;  %3494 = vrsqrt.f32 %v373_v26 }
 0x214   :  { %v375_v40 = vadd.f32 1e-06, %v371_v38 }
 0x215   :  { %v397_v13 = vpop.permute.xlu0 %396 }
 0x216   :  { %v358_v41 = vpop.xlane.xlu1 %357  ;;  %3496 = vrsqrt.f32 %v375_v40 }
 0x217   :  { %v368_v42 = vmul.f32 0.03125, %v358_v41 }
 0x219   :  { %v372_v45 = vadd.f32 1e-06, %v368_v42 }
 0x21a   :  { %v364_v46 = vpop.xlane.xlu1 %363 }
 0x21b   :  { %3498 = vrsqrt.f32 %v372_v45  ;;  %v370_v48 = vmul.f32 0.03125, %v364_v46 }
 0x21c   :  { %v3495_v51 = vpop.eup %3494 }
 0x21d   :  { %v374_v49 = vadd.f32 1e-06, %v370_v48  ;;  %v381_v52 = vmul.f32 %v3495_v51, %v3794_v44 }
 0x21e   :  { %v399_v1 = vpop.permute.xlu1 %398 }
 0x21f   :  { %3500 = vrsqrt.f32 %v374_v49  ;;  %v405_v62 = vmul.f32 %v395_v36, %v381_v52 }
 0x220   :  { %v3497_v54 = vpop.eup %3496 }
 0x221   :  { %v383_v63 = vmul.f32 %v3497_v54, %v3808_v57  ;;  %v409_v14 = vadd.f32 %v405_v62, %v3780_v33 }
 0x222   :  { %v452_v57 = vpop.permute.xlu1 %451 }
 0x223   :  { %v407_v12 = vmul.f32 %v399_v1, %v383_v63 }
 0x225   :  { %v3499_v56 = vpop.eup %3498 }
 0x226   :  { %v380_v59 = vmul.f32 %v3499_v56, %v3805_v55  ;;  %v411_v55 = vadd.f32 %v407_v12, %v3841_v23 }
 0x228   :  { %v404_v5 = vmul.f32 %v393_v29, %v380_v59 }
 0x229   :  { %v3501_v8 = vpop.eup %3500 }
 0x22a   :  { %v382_v9 = vmul.f32 %v3501_v8, %v350_v17  ;;  %v408_v10 = vadd.f32 %v404_v5, %v3775_v30  ;;  %v450_v17 = vpop.permute.xlu0 %449 }
 0x22b   :  { %v454_v19 = vsel %vm453_vm2, %v450_v17, %v452_v57 }
 0x22c   :  { %v406_v18 = vmul.f32 %v397_v13, %v382_v9  ;;  %2986 = vmatprep.mubr.msk.f32.mxu1 %vm52_vm0, %v408_v10 }
 0x22d   :  { %2987 = vmatmul.mubr.msk.f32.vlgmr.msra.gmra.mrb[12].mxu1 %vm52_vm0, %v409_v14 }
 0x22e   :  { %v410_v44 = vadd.f32 %v406_v18, %v3839_v22 }
 0x230   :  { %2989 = vmatprep.mubr.msk.f32.mxu1 %vm52_vm0, %v410_v44 }
 0x231   :  { %2990 = vmatmul.mubr.msk.f32.gmra.mrb[14].mxu1 %vm52_vm0, %v411_v55 }
 0x300   :  { %v2988_v20 = vpop.f32.mrb[12].mxu1 }
 0x301   :  { %v3869_v21 = vadd.f32 %v2988_v20, %v454_v19  ;;  %v534_v24 = vpop.f32.mrb[13].mxu1 }
 0x302   :  { %v535_v4 = vadd.f32 %v534_v24, %v454_v19 }
 0x304   :  { %v2991_v0 = vpop.f32.mrb[14].mxu1  ;;  %2996 = vmatprep.mubr.msk.f32.mxu0 %vm559_vm3, %v535_v4  ;;  %v3873_v11 = vpack.i.bf16 %v3869_v21, %v535_v4 }
 0x305   :  { %v3875_v28 = vadd.f32 %v2991_v0, %v454_v19  ;;  %v544_v29 = vpop.f32.mrb[15].mxu1 }
 0x306   :  { %v545_v7 = vadd.f32 %v544_v29, %v454_v19  ;;  %3379 = vrot.lane.b32.xlu0 %v3873_v11, %s3587_s11 }
 0x308   :  { %3003 = vmatprep.mubr.msk.f32.mxu1 %vm559_vm3, %v545_v7  ;;  %v3881_v32 = vpack.i.bf16 %v3875_v28, %v545_v7 }
 0x30a   :  { %3394 = vrot.lane.b32.xlu1 %v3881_v32, %s3587_s11  ;;  %3384 = vrot.lane.b32.xlu0 %v3873_v11, %s3591_s26 }
 0x30e   :  { %732 = vrot.lane.b32.xlu1 %v535_v4, %s3592_s27  ;;  %3389 = vrot.lane.b32.xlu0 %v3873_v11, %s3593_s0 }
 0x312   :  { %3399 = vrot.lane.b32.xlu1 %v3881_v32, %s3591_s26  ;;  %734 = vrot.lane.b32.xlu0 %v3869_v21, %s3592_s27 }
 0x316   :  { %825 = vrot.lane.b32.xlu1 %v3875_v28, %s3592_s27  ;;  %3404 = vrot.lane.b32.xlu0 %v3873_v11, %s3594_s28 }
 0x31a   :  { %3409 = vrot.lane.b32.xlu1 %v3881_v32, %s3593_s0  ;;  %823 = vrot.lane.b32.xlu0 %v545_v7, %s3592_s27 }
 0x31e   :  { %914 = vrot.lane.b32.xlu1 %v535_v4, %s3595_s1  ;;  %916 = vrot.lane.b32.xlu0 %v3869_v21, %s3595_s1 }
 0x322   :  { %3414 = vrot.lane.b32.xlu1 %v3881_v32, %s3594_s28  ;;  %1005 = vrot.lane.b32.xlu0 %v545_v7, %s3595_s1 }
 0x326   :  { %1007 = vrot.lane.b32.xlu1 %v3875_v28, %s3595_s1  ;;  %1096 = vrot.lane.b32.xlu0 %v535_v4, %s3596_s29 }
 0x32a   :  { %1098 = vrot.lane.b32.xlu1 %v3869_v21, %s3596_s29  ;;  %1187 = vrot.lane.b32.xlu0 %v545_v7, %s3596_s29 }
 0x32e   :  { %1189 = vrot.lane.b32.xlu1 %v3875_v28, %s3596_s29  ;;  %3429 = vrot.lane.b32.xlu0 %v3881_v32, %s3590_s25 }
 0x332   :  { %3419 = vrot.lane.b32.xlu1 %v3873_v11, %s3590_s25 }
 0x336   :  { %3424 = vrot.lane.b32.xlu1 %v3873_v11, %s3597_s30 }
 0x33a   :  { %3434 = vrot.lane.b32.xlu1 %v3881_v32, %s3597_s30 }
 0x378   :  { %v3380_v35 = vpop.permute.xlu0 %3379 }
 0x379   :  { %v3382_v36 = vunpack.i.h.bf16 %v3380_v35  ;;  %v3381_v26 = vunpack.i.l.bf16 %v3380_v35 }
 0x37b   :  { %v3194_v40 = vpack.c.bf16 %v3382_v36, %v3381_v26 }
 0x37c   :  { %v3395_v41 = vpop.permute.xlu1 %3394  ;;  %v3385_v42 = vpop.permute.xlu0 %3384 }
 0x37d   :  { %v3397_v45 = vunpack.i.h.bf16 %v3395_v41  ;;  %v3396_v46 = vunpack.i.l.bf16 %v3395_v41  ;;  %v3387_v48 = vunpack.i.h.bf16 %v3385_v42  ;;  %v3386_v49 = vunpack.i.l.bf16 %v3385_v42  ;;  %3196 = vmatprep.subr.msk.bf16.mxu0 %vm3905_vm4, %v3194_v40 }
 0x37e   :  { %3199 = vmatpush3.bf16.xpose.msk.msra.mxu0 %vm3905_vm4, %v3194_v40 }
 0x37f   :  { %v3200_v51 = vpack.c.bf16 %v3397_v45, %v3396_v46  ;;  %v3206_v52 = vpack.c.bf16 %v3387_v48, %v3386_v49 }
 0x380   :  { %v733_v54 = vpop.permute.xlu1 %732  ;;  %v3390_v56 = vpop.permute.xlu0 %3389 }
 0x381   :  { %v3392_v59 = vunpack.i.h.bf16 %v3390_v56  ;;  %v3391_v62 = vunpack.i.l.bf16 %v3390_v56  ;;  %3202 = vmatprep.subr.msk.bf16.mxu1 %vm3905_vm4, %v3200_v51  ;;  %3208 = vmatprep.subr.msk.bf16.mxu0 %vm3905_vm4, %v3206_v52 }
 0x382   :  { %3205 = vmatpush3.bf16.xpose.msk.msra.mxu1 %vm3905_vm4, %v3200_v51 }
 0x383   :  { %v3218_v5 = vpack.c.bf16 %v3392_v59, %v3391_v62 }
 0x384   :  { %v3400_v63 = vpop.permute.xlu1 %3399  ;;  %v735_v1 = vpop.permute.xlu0 %734 }
 0x385   :  { %v3402_v8 = vunpack.i.h.bf16 %v3400_v63  ;;  %v3401_v9 = vunpack.i.l.bf16 %v3400_v63  ;;  %2997 = vmatmul.mubr.msk.f32.vlgmr.msra.gmra.mrb[0].mxu0 %vm559_vm3, %v3869_v21 }
 0x386   :  { %3211 = vmatpush3.bf16.xpose.msk.msra.mxu0 %vm3905_vm4, %v3206_v52  ;;  %3010 = vmatprep.mubr.msk.f32.mxu0 %vm559_vm3, %v733_v54 }
 0x387   :  { %v3212_v10 = vpack.c.bf16 %v3402_v8, %v3401_v9  ;;  %3220 = vmatprep.subr.msk.bf16.mxu0 %vm3905_vm4, %v3218_v5 }
 0x388   :  { %v826_v12 = vpop.permute.xlu1 %825  ;;  %v3405_v13 = vpop.permute.xlu0 %3404 }
 0x389   :  { %v3407_v14 = vunpack.i.h.bf16 %v3405_v13  ;;  %v3406_v18 = vunpack.i.l.bf16 %v3405_v13  ;;  %3004 = vmatmul.mubr.msk.f32.vlgmr.msra.gmra.mrb[16].mxu1 %vm559_vm3, %v3875_v28  ;;  %3214 = vmatprep.subr.msk.bf16.mxu1 %vm3905_vm4, %v3212_v10 }
 0x38a   :  { %3217 = vmatpush3.bf16.xpose.msk.msra.mxu1 %vm3905_vm4, %v3212_v10 }
 0x38b   :  { %v3230_v57 = vpack.c.bf16 %v3407_v14, %v3406_v18 }
 0x38c   :  { %v3410_v44 = vpop.permute.xlu1 %3409  ;;  %v824_v55 = vpop.permute.xlu0 %823 }
 0x38d   :  { %v3412_v17 = vunpack.i.h.bf16 %v3410_v44  ;;  %v3411_v19 = vunpack.i.l.bf16 %v3410_v44  ;;  %3011 = vmatmul.mubr.msk.f32.vlgmr.msra.gmra.mrb[2].mxu0 %vm559_vm3, %v735_v1  ;;  %3017 = vmatprep.mubr.msk.f32.mxu1 %vm559_vm3, %v824_v55 }
 0x38e   :  { %3223 = vmatpush3.bf16.xpose.msk.msra.mxu0 %vm3905_vm4, %v3218_v5 }
 0x38f   :  { %v3224_v20 = vpack.c.bf16 %v3412_v17, %v3411_v19  ;;  %3232 = vmatprep.subr.msk.bf16.mxu0 %vm3905_vm4, %v3230_v57 }
 0x390   :  { %v915_v21 = vpop.permute.xlu1 %914  ;;  %v917_v24 = vpop.permute.xlu0 %916 }
 0x391   :  { %3018 = vmatmul.mubr.msk.f32.vlgmr.msra.gmra.mrb[18].mxu1 %vm559_vm3, %v826_v12  ;;  %3024 = vmatprep.mubr.msk.f32.mxu0 %vm559_vm3, %v915_v21 }
 0x392   :  { %3226 = vmatprep.subr.msk.bf16.mxu1 %vm3905_vm4, %v3224_v20 }
 0x393   :  { %3229 = vmatpush3.bf16.xpose.msk.msra.mxu1 %vm3905_vm4, %v3224_v20 }
 0x394   :  { %v3415_v4 = vpop.permute.xlu1 %3414  ;;  %v1006_v0 = vpop.permute.xlu0 %1005 }
 0x395   :  { %v3417_v28 = vunpack.i.h.bf16 %v3415_v4  ;;  %v3416_v29 = vunpack.i.l.bf16 %v3415_v4  ;;  %3025 = vmatmul.mubr.msk.f32.vlgmr.msra.gmra.mrb[4].mxu0 %vm559_vm3, %v917_v24  ;;  %3031 = vmatprep.mubr.msk.f32.mxu1 %vm559_vm3, %v1006_v0 }
 0x396   :  { %3235 = vmatpush3.bf16.xpose.msk.msra.mxu0 %vm3905_vm4, %v3230_v57 }
 0x397   :  { %v3236_v7 = vpack.c.bf16 %v3417_v28, %v3416_v29 }
 0x398   :  { %v1008_v35 = vpop.permute.xlu1 %1007  ;;  %v1097_v36 = vpop.permute.xlu0 %1096 }
 0x399   :  { %3038 = vmatprep.mubr.msk.f32.mxu0 %vm559_vm3, %v1097_v36  ;;  %3238 = vmatprep.subr.msk.bf16.mxu1 %vm3905_vm4, %v3236_v7 }
 0x39a   :  { %3032 = vmatmul.mubr.msk.f32.vlgmr.msra.gmra.mrb[20].mxu1 %vm559_vm3, %v1008_v35 }
 0x39b   :  { %3241 = vmatpush3.bf16.xpose.msk.msra.mxu1 %vm3905_vm4, %v3236_v7 }
 0x39c   :  { %v1099_v26 = vpop.permute.xlu1 %1098  ;;  %v1188_v40 = vpop.permute.xlu0 %1187 }
 0x39d   :  { %3039 = vmatmul.mubr.msk.f32.vlgmr.msra.gmra.mrb[6].mxu0 %vm559_vm3, %v1099_v26  ;;  %3045 = vmatprep.mubr.msk.f32.mxu1 %vm559_vm3, %v1188_v40 }
 0x3a0   :  { %v1190_v41 = vpop.permute.xlu1 %1189  ;;  %v3430_v42 = vpop.permute.xlu0 %3429 }
 0x3a1   :  { %v3432_v45 = vunpack.i.h.bf16 %v3430_v42  ;;  %v3431_v46 = vunpack.i.l.bf16 %v3430_v42 }
 0x3a2   :  { %3046 = vmatmul.mubr.msk.f32.vlgmr.msra.gmra.mrb[22].mxu1 %vm559_vm3, %v1190_v41 }
 0x3a3   :  { %v3246_v48 = vpack.c.bf16 %v3432_v45, %v3431_v46 }
 0x3a4   :  { %v3420_v49 = vpop.permute.xlu1 %3419 }
 0x3a5   :  { %v3422_v51 = vunpack.i.h.bf16 %v3420_v49  ;;  %v3421_v52 = vunpack.i.l.bf16 %v3420_v49  ;;  %3247 = vmatprep.subr.bf16.mxu1 %v3246_v48 }
 0x3a6   :  { %3249 = vmatpush3.bf16.msra.mxu1 %v3246_v48 }
 0x3a7   :  { %v3242_v38 = vpack.c.bf16 %v3422_v51, %v3421_v52 }
 0x3a8   :  { %v3425_v54 = vpop.permute.xlu1 %3424 }
 0x3a9   :  { %v3427_v56 = vunpack.i.h.bf16 %v3425_v54  ;;  %v3426_v59 = vunpack.i.l.bf16 %v3425_v54  ;;  %3243 = vmatprep.subr.bf16.mxu0 %v3242_v38 }
 0x3aa   :  { %3245 = vmatpush3.bf16.msra.mxu0 %v3242_v38 }
 0x3ab   :  { %v3957_v62 = vpack.c.bf16 %v3427_v56, %v3426_v59 }
 0x3ac   :  { %v3435_v63 = vpop.permute.xlu1 %3434 }
 0x3ad   :  { %v3437_v1 = vunpack.i.h.bf16 %v3435_v63  ;;  %v3436_v5 = vunpack.i.l.bf16 %v3435_v63  ;;  %3251 = vmatprep.subr.bf16.mxu0 %v3957_v62 }
 0x3af   :  { %v3960_v8 = vpack.c.bf16 %v3437_v1, %v3436_v5 }
 0x3b1   :  { %3255 = vmatprep.subr.bf16.mxu1 %v3960_v8 }
 0x458   :  { %v2998_v9 = vpop.f32.mrb[0].mxu0 }
 0x459   :  { %v634_v10 = vpop.f32.mrb[1].mxu0  ;;  %v1282_v12 = vsel %vm1278_vm5, %v2998_v9, -inf }
 0x45a   :  { %1283 = vmax.xlane.f32.xlu1 %v1282_v12  ;;  %v1279_v13 = vsel %vm1278_vm5, %v634_v10, -inf }
 0x45b   :  { %1280 = vmax.xlane.f32.xlu0 %v1279_v13 }
 0x45c   :  { %v3005_v14 = vpop.f32.mrb[16].mxu1 }
 0x45d   :  { %v723_v18 = vpop.f32.mrb[17].mxu1  ;;  %v1306_v44 = vsel %vm1278_vm5, %v3005_v14, -inf }
 0x45e   :  { %v1303_v19 = vsel %vm1278_vm5, %v723_v18, -inf }
 0x45f   :  { %1307 = vmax.xlane.f32.xlu0 %v1306_v44 }
 0x460   :  { %v3012_v55 = vpop.f32.mrb[2].mxu0 }
 0x461   :  { %v3966_v57 = vpop.f32.mrb[3].mxu0  ;;  %v1288_v17 = vsel %vm1278_vm5, %v3012_v55, -inf }
 0x462   :  { %1289 = vmax.xlane.f32.xlu1 %v1288_v17  ;;  %v1285_v24 = vsel %vm1278_vm5, %v3966_v57, -inf }
 0x463   :  { %1304 = vmax.xlane.f32.xlu0 %v1303_v19 }
 0x464   :  { %v3970_v20 = vpop.f32.mrb[18].mxu1 }
 0x465   :  { %v3972_v21 = vpop.f32.mrb[19].mxu1  ;;  %v1312_v29 = vsel %vm1278_vm5, %v3970_v20, -inf }
 0x466   :  { %v1309_v26 = vsel %vm1278_vm5, %v3972_v21, -inf }
 0x467   :  { %1286 = vmax.xlane.f32.xlu0 %v1285_v24 }
 0x468   :  { %v3976_v4 = vpop.f32.mrb[4].mxu0 }
 0x469   :  { %v3978_v0 = vpop.f32.mrb[5].mxu0  ;;  %v1294_v28 = vsel %vm1278_vm5, %v3976_v4, -inf }
 0x46a   :  { %1295 = vmax.xlane.f32.xlu1 %v1294_v28  ;;  %v1291_v35 = vsel %vm1278_vm5, %v3978_v0, -inf }
 0x46b   :  { %1313 = vmax.xlane.f32.xlu0 %v1312_v29 }
 0x46d   :  { %v3984_v7 = vpop.f32.mrb[20].mxu1 }
 0x46e   :  { %v3988_v36 = vpop.f32.mrb[21].mxu1  ;;  %1292 = vmax.xlane.f32.xlu1 %v1291_v35  ;;  %v1318_v45 = vsel %vm1278_vm5, %v3984_v7, -inf }
 0x46f   :  { %1310 = vmax.xlane.f32.xlu0 %v1309_v26  ;;  %v1315_v51 = vsel %vm1278_vm5, %v3988_v36, -inf }
 0x470   :  { %v3992_v40 = vpop.f32.mrb[6].mxu0 }
 0x471   :  { %v3994_v41 = vpop.f32.mrb[7].mxu0  ;;  %v1300_v42 = vsel %vm1278_vm5, %v3992_v40, -inf }
 0x472   :  { %1301 = vmax.xlane.f32.xlu1 %v1300_v42  ;;  %v1297_v48 = vsel %vm1278_vm5, %v3994_v41, -inf }
 0x473   :  { %1319 = vmax.xlane.f32.xlu0 %v1318_v45 }
 0x475   :  { %v4000_v46 = vpop.f32.mrb[22].mxu1 }
 0x476   :  { %v4004_v49 = vpop.f32.mrb[23].mxu1  ;;  %1298 = vmax.xlane.f32.xlu1 %v1297_v48  ;;  %v1324_v38 = vsel %vm1278_vm5, %v4000_v46, -inf }
 0x477   :  { %1316 = vmax.xlane.f32.xlu0 %v1315_v51  ;;  %v1321_v52 = vsel %vm1278_vm5, %v4004_v49, -inf }
 0x47a   :  { %1322 = vmax.xlane.f32.xlu1 %v1321_v52 }
 0x47b   :  { %1325 = vmax.xlane.f32.xlu0 %v1324_v38 }
 0x48b   :  { %3444 = vrot.lane.b32.xlu1 %v3881_v32, %s3598_s7 }
 0x491   :  { %3439 = vrot.lane.b32.xlu0 %v3873_v11, %s3598_s7 }
 0x4e7   :  { %v1284_v54 = vpop.xlane.xlu1 %1283 }
 0x4e8   :  { %v1328_v56 = vsub.f32 %v2998_v9, %v1284_v54  ;;  %v1281_v59 = vpop.xlane.xlu0 %1280 }
 0x4e9   :  { %v1327_v63 = vsub.f32 %v634_v10, %v1281_v59 }
 0x4ea   :  { %v1345_v1 = vmul.f32 1.442695, %v1328_v56 }
 0x4eb   :  { %v1343_v5 = vmul.f32 1.442695, %v1327_v63 }
 0x4ec   :  { %3502 = vpow2.f32 %v1345_v1  ;;  %v1308_v12 = vpop.xlane.xlu0 %1307 }
 0x4ed   :  { %3504 = vpow2.f32 %v1343_v5  ;;  %v1336_v13 = vsub.f32 %v3005_v14, %v1308_v12 }
 0x4ef   :  { %v1361_v44 = vmul.f32 1.442695, %v1336_v13  ;;  %v1290_v17 = vpop.xlane.xlu1 %1289 }
 0x4f0   :  { %v1330_v19 = vsub.f32 %v3012_v55, %v1290_v17  ;;  %v1305_v24 = vpop.xlane.xlu0 %1304 }
 0x4f1   :  { %3506 = vpow2.f32 %v1361_v44  ;;  %v1335_v28 = vsub.f32 %v723_v18, %v1305_v24 }
 0x4f2   :  { %v1349_v29 = vmul.f32 1.442695, %v1330_v19 }
 0x4f3   :  { %v1359_v35 = vmul.f32 1.442695, %v1335_v28 }
 0x4f4   :  { %3508 = vpow2.f32 %v1349_v29  ;;  %v1287_v26 = vpop.xlane.xlu0 %1286 }
 0x4f5   :  { %3510 = vpow2.f32 %v1359_v35  ;;  %v1329_v9 = vsub.f32 %v3966_v57, %v1287_v26 }
 0x4f6   :  { %v4015_v10 = vpop.eup %3502 }
 0x4f7   :  { %v4017_v42 = vpop.eup %3504  ;;  %v1347_v45 = vmul.f32 1.442695, %v1329_v9  ;;  %v1296_v48 = vpop.xlane.xlu1 %1295  ;;  %v1378_v14 = vsel %vm1278_vm5, %v4015_v10, 0.0 }
 0x4f8   :  { %v1332_v55 = vsub.f32 %v3976_v4, %v1296_v48  ;;  %1379 = vadd.xlane.f32.xlu0 %v1378_v14  ;;  %v1314_v18 = vpop.xlane.xlu0 %1313  ;;  %v1375_v51 = vsel %vm1278_vm5, %v4017_v42, 0.0 }
 0x4f9   :  { %3512 = vpow2.f32 %v1347_v45  ;;  %v1338_v52 = vsub.f32 %v3970_v20, %v1314_v18  ;;  %1376 = vadd.xlane.f32.xlu1 %v1375_v51 }
 0x4fa   :  { %v1353_v57 = vmul.f32 1.442695, %v1332_v55 }
 0x4fb   :  { %v4025_v38 = vpop.eup %3506  ;;  %v1365_v54 = vmul.f32 1.442695, %v1338_v52  ;;  %v1293_v56 = vpop.xlane.xlu1 %1292 }
 0x4fc   :  { %3514 = vpow2.f32 %v1353_v57  ;;  %v1331_v59 = vsub.f32 %v3978_v0, %v1293_v56  ;;  %v1311_v63 = vpop.xlane.xlu0 %1310  ;;  %v1402_v4 = vsel %vm1278_vm5, %v4025_v38, 0.0 }
 0x4fd   :  { %3516 = vpow2.f32 %v1365_v54  ;;  %v1337_v1 = vsub.f32 %v3972_v21, %v1311_v63  ;;  %1403 = vadd.xlane.f32.xlu0 %v1402_v4 }
 0x4fe   :  { %v4031_v5 = vpop.eup %3508  ;;  %v1351_v20 = vmul.f32 1.442695, %v1331_v59 }
 0x4ff   :  { %v4033_v12 = vpop.eup %3510  ;;  %v1363_v13 = vmul.f32 1.442695, %v1337_v1  ;;  %v1302_v44 = vpop.xlane.xlu1 %1301  ;;  %v1384_v17 = vsel %vm1278_vm5, %v4031_v5, 0.0 }
 0x500   :  { %3518 = vpow2.f32 %v1351_v20  ;;  %v1334_v0 = vsub.f32 %v3992_v40, %v1302_v44  ;;  %v1320_v19 = vpop.xlane.xlu0 %1319  ;;  %1385 = vadd.xlane.f32.xlu1 %v1384_v17  ;;  %v1399_v24 = vsel %vm1278_vm5, %v4033_v12, 0.0 }
 0x501   :  { %3520 = vpow2.f32 %v1363_v13  ;;  %v1340_v21 = vsub.f32 %v3984_v7, %v1320_v19  ;;  %1400 = vadd.xlane.f32.xlu0 %v1399_v24 }
 0x502   :  { %v1357_v28 = vmul.f32 1.442695, %v1334_v0 }
 0x503   :  { %v4041_v29 = vpop.eup %3512  ;;  %v1369_v35 = vmul.f32 1.442695, %v1340_v21  ;;  %v1299_v26 = vpop.xlane.xlu1 %1298 }
 0x504   :  { %3522 = vpow2.f32 %v1357_v28  ;;  %v1333_v9 = vsub.f32 %v3994_v41, %v1299_v26  ;;  %v1317_v45 = vpop.xlane.xlu0 %1316  ;;  %v1381_v40 = vsel %vm1278_vm5, %v4041_v29, 0.0 }
 0x505   :  { %3524 = vpow2.f32 %v1369_v35  ;;  %v1339_v48 = vsub.f32 %v3988_v36, %v1317_v45  ;;  %1382 = vadd.xlane.f32.xlu1 %v1381_v40 }
 0x506   :  { %v4047_v14 = vpop.eup %3514  ;;  %v1355_v7 = vmul.f32 1.442695, %v1333_v9 }
 0x507   :  { %v4049_v55 = vpop.eup %3516  ;;  %v1367_v18 = vmul.f32 1.442695, %v1339_v48  ;;  %v1323_v51 = vpop.xlane.xlu1 %1322  ;;  %v1390_v52 = vsel %vm1278_vm5, %v4047_v14, 0.0 }
 0x508   :  { %3526 = vpow2.f32 %v1355_v7  ;;  %v1341_v41 = vsub.f32 %v4004_v49, %v1323_v51  ;;  %v1326_v57 = vpop.xlane.xlu0 %1325  ;;  %v1408_v54 = vsel %vm1278_vm5, %v4049_v55, 0.0 }
 0x509   :  { %3528 = vpow2.f32 %v1367_v18  ;;  %v1342_v36 = vsub.f32 %v4000_v46, %v1326_v57  ;;  %1409 = vadd.xlane.f32.xlu0 %v1408_v54  ;;  %1391 = vadd.xlane.f32.xlu1 %v1390_v52 }
 0x50a   :  { %v4057_v56 = vpop.eup %3518  ;;  %v1371_v59 = vmul.f32 1.442695, %v1341_v41 }
 0x50b   :  { %v4059_v63 = vpop.eup %3520  ;;  %v1373_v4 = vmul.f32 1.442695, %v1342_v36  ;;  %v1387_v1 = vsel %vm1278_vm5, %v4057_v56, 0.0  ;;  %v3445_v45 = vpop.permute.xlu1 %3444 }
 0x50c   :  { %3530 = vpow2.f32 %v1371_v59  ;;  %v1405_v49 = vsel %vm1278_vm5, %v4059_v63, 0.0  ;;  %v3440_v9 = vpop.permute.xlu0 %3439 }
 0x50d   :  { %3532 = vpow2.f32 %v1373_v4  ;;  %1406 = vadd.xlane.f32.xlu0 %v1405_v49  ;;  %1388 = vadd.xlane.f32.xlu1 %v1387_v1  ;;  %v3442_v57 = vunpack.i.h.bf16 %v3440_v9  ;;  %v3441_v54 = vunpack.i.l.bf16 %v3440_v9 }
 0x50e   :  { %v4065_v20 = vpop.eup %3522 }
 0x50f   :  { %v4067_v46 = vpop.eup %3524  ;;  %v1396_v13 = vsel %vm1278_vm5, %v4065_v20, 0.0  ;;  %v3258_v59 = vpack.c.bf16 %v3442_v57, %v3441_v54 }
 0x510   :  { %v1414_v44 = vsel %vm1278_vm5, %v4067_v46, 0.0 }
 0x511   :  { %1415 = vadd.xlane.f32.xlu0 %v1414_v44  ;;  %1397 = vadd.xlane.f32.xlu1 %v1396_v13  ;;  %v3447_v44 = vunpack.i.h.bf16 %v3445_v45 }
 0x512   :  { %v4073_v17 = vpop.eup %3526 }
 0x513   :  { %v4075_v0 = vpop.eup %3528  ;;  %v1393_v19 = vsel %vm1278_vm5, %v4073_v17, 0.0 }
 0x514   :  { %v1411_v24 = vsel %vm1278_vm5, %v4075_v0, 0.0 }
 0x515   :  { %1412 = vadd.xlane.f32.xlu0 %v1411_v24  ;;  %1394 = vadd.xlane.f32.xlu1 %v1393_v19  ;;  %v3446_v19 = vunpack.i.l.bf16 %v3445_v45 }
 0x516   :  { %v4081_v21 = vpop.eup %3530 }
 0x517   :  { %v4083_v28 = vpop.eup %3532  ;;  %v1417_v35 = vsel %vm1278_vm5, %v4081_v21, 0.0  ;;  %v3262_v9 = vpack.c.bf16 %v3447_v44, %v3446_v19 }
 0x518   :  { %v1420_v26 = vsel %vm1278_vm5, %v4083_v28, 0.0 }
 0x519   :  { %1421 = vadd.xlane.f32.xlu0 %v1420_v26  ;;  %1418 = vadd.xlane.f32.xlu1 %v1417_v35 }
 0x52a   :  { %3454 = vrot.lane.b32.xlu1 %v3881_v32, %s3599_s8 }
 0x52f   :  { %3449 = vrot.lane.b32.xlu0 %v3873_v11, %s3599_s8 }
 0x585   :  { %v1380_v40 = vpop.xlane.xlu0 %1379 }
 0x586   :  { %3534 = vrcp.f32 %v1380_v40  ;;  %v1377_v48 = vpop.xlane.xlu1 %1376 }
 0x587   :  { %3536 = vrcp.f32 %v1377_v48 }
 0x58a   :  { %v1404_v7 = vpop.xlane.xlu0 %1403 }
 0x58b   :  { %3538 = vrcp.f32 %v1404_v7 }
 0x58d   :  { %v1386_v18 = vpop.xlane.xlu1 %1385 }
 0x58e   :  { %v1401_v51 = vpop.xlane.xlu0 %1400 }
 0x58f   :  { %3540 = vrcp.f32 %v1401_v51 }
 0x590   :  { %v3535_v52 = vpop.eup %3534  ;;  %3542 = vrcp.f32 %v1386_v18 }
 0x591   :  { %v3537_v41 = vpop.eup %3536  ;;  %v1426_v11 = vmul.f32 %v3535_v52, %v4015_v10 }
 0x592   :  { %v1383_v36 = vpop.xlane.xlu1 %1382  ;;  %v1424_v32 = vmul.f32 %v3537_v41, %v4017_v42 }
 0x593   :  { %3544 = vrcp.f32 %v1383_v36 }
 0x594   :  { %3052 = vmatprep.mubr.msk.f32.mxu0 %vm1278_vm5, %v1424_v32 }
 0x595   :  { %3053 = vmatmul.mubr.msk.f32.vlgmr.msra.gmra.mrb[8].mxu0 %vm1278_vm5, %v1426_v11  ;;  %v3539_v49 = vpop.eup %3538 }
 0x596   :  { %3253 = vmatpush3.bf16.msra.mxu0 %v3957_v62  ;;  %v1410_v4 = vpop.xlane.xlu0 %1409  ;;  %v1392_v1 = vpop.xlane.xlu1 %1391  ;;  %v1442_v35 = vmul.f32 %v3539_v49, %v4025_v38 }
 0x597   :  { %3259 = vmatprep.subr.bf16.mxu0 %v3258_v59  ;;  %3546 = vrcp.f32 %v1410_v4 }
 0x598   :  { %3548 = vrcp.f32 %v1392_v1 }
 0x599   :  { %v3541_v13 = vpop.eup %3540 }
 0x59a   :  { %v1407_v42 = vpop.xlane.xlu0 %1406  ;;  %v1389_v24 = vpop.xlane.xlu1 %1388  ;;  %v1440_v10 = vmul.f32 %v3541_v13, %v4033_v12 }
 0x59b   :  { %3550 = vrcp.f32 %v1407_v42  ;;  %v3543_v26 = vpop.eup %3542 }
 0x59c   :  { %3552 = vrcp.f32 %v1389_v24  ;;  %3059 = vmatprep.mubr.msk.f32.mxu1 %vm1278_vm5, %v1440_v10  ;;  %v1430_v7 = vmul.f32 %v3543_v26, %v4031_v5 }
 0x59d   :  { %v3545_v62 = vpop.eup %3544  ;;  %3060 = vmatmul.mubr.msk.f32.vlgmr.msra.gmra.mrb[24].mxu1 %vm1278_vm5, %v1442_v35 }
 0x59e   :  { %3257 = vmatpush3.bf16.msra.mxu1 %v3960_v8  ;;  %v1416_v45 = vpop.xlane.xlu0 %1415  ;;  %v1398_v40 = vpop.xlane.xlu1 %1397  ;;  %v1428_v48 = vmul.f32 %v3545_v62, %v4041_v29 }
 0x59f   :  { %3263 = vmatprep.subr.bf16.mxu1 %v3262_v9  ;;  %3554 = vrcp.f32 %v1416_v45 }
 0x5a0   :  { %3066 = vmatprep.mubr.msk.f32.mxu0 %vm1278_vm5, %v1428_v48 }
 0x5a1   :  { %3067 = vmatmul.mubr.msk.f32.vlgmr.msra.gmra.mrb[10].mxu0 %vm1278_vm5, %v1430_v7  ;;  %v3547_v18 = vpop.eup %3546 }
 0x5a2   :  { %3261 = vmatpush3.bf16.msra.mxu0 %v3258_v59  ;;  %v1413_v38 = vpop.xlane.xlu0 %1412  ;;  %v1395_v12 = vpop.xlane.xlu1 %1394  ;;  %v1446_v57 = vmul.f32 %v3547_v18, %v4049_v55 }
 0x5a3   :  { %3556 = vrcp.f32 %v1413_v38  ;;  %v3549_v51 = vpop.eup %3548 }
 0x5a4   :  { %3558 = vrcp.f32 %v1395_v12  ;;  %v1434_v36 = vmul.f32 %v3549_v51, %v4047_v14 }
 0x5a5   :  { %v3551_v8 = vpop.eup %3550  ;;  %3560 = vrcp.f32 %v1398_v40 }
 0x5a6   :  { %v3553_v52 = vpop.eup %3552  ;;  %v1422_v41 = vpop.xlane.xlu0 %1421  ;;  %v1444_v5 = vmul.f32 %v3551_v8, %v4059_v63 }
 0x5a7   :  { %v1419_v29 = vpop.xlane.xlu1 %1418  ;;  %3562 = vrcp.f32 %v1422_v41  ;;  %v1432_v54 = vmul.f32 %v3553_v52, %v4057_v56 }
 0x5a8   :  { %3564 = vrcp.f32 %v1419_v29  ;;  %3073 = vmatprep.mubr.msk.f32.mxu1 %vm1278_vm5, %v1444_v5 }
 0x5a9   :  { %3080 = vmatprep.mubr.msk.f32.mxu0 %vm1278_vm5, %v1432_v54  ;;  %3074 = vmatmul.mubr.msk.f32.vlgmr.msra.gmra.mrb[26].mxu1 %vm1278_vm5, %v1446_v57  ;;  %v3555_v4 = vpop.eup %3554 }
 0x5aa   :  { %3081 = vmatmul.mubr.msk.f32.vlgmr.msra.gmra.mrb[12].mxu0 %vm1278_vm5, %v1434_v36  ;;  %3265 = vmatpush3.bf16.msra.mxu1 %v3262_v9  ;;  %v3450_v32 = vpop.permute.xlu0 %3449  ;;  %v1450_v24 = vmul.f32 %v3555_v4, %v4067_v46  ;;  %v3582_v46 = vld [vmem:[%s4369_s3 + $0x50] sm:$0xff] }
 0x5ab   :  { %v3455_v11 = vpop.permute.xlu1 %3454  ;;  %v3452_v63 = vunpack.i.h.bf16 %v3450_v32  ;;  %v3451_v59 = vunpack.i.l.bf16 %v3450_v32 }
 0x5ac   :  { %v3457_v55 = vunpack.i.h.bf16 %v3455_v11  ;;  %v3456_v1 = vunpack.i.l.bf16 %v3455_v11 }
 0x5ad   :  { %v3557_v56 = vpop.eup %3556  ;;  %v3266_v49 = vpack.c.bf16 %v3452_v63, %v3451_v59 }
 0x5ae   :  { %v3559_v14 = vpop.eup %3558  ;;  %v3270_v13 = vpack.c.bf16 %v3457_v55, %v3456_v1  ;;  %v1448_v44 = vmul.f32 %v3557_v56, %v4075_v0 }
 0x5af   :  { %v3561_v19 = vpop.eup %3560  ;;  %3267 = vmatprep.subr.bf16.mxu0 %v3266_v49  ;;  %v1436_v42 = vmul.f32 %v3559_v14, %v4073_v17 }
 0x5b0   :  { %3271 = vmatprep.subr.bf16.mxu1 %v3270_v13  ;;  %3087 = vmatprep.mubr.msk.f32.mxu1 %vm1278_vm5, %v1448_v44  ;;  %v1438_v26 = vmul.f32 %v3561_v19, %v4065_v20  ;;  %v3583_v20 = vld [vmem:[%s4369_s3 + $0x70] sm:$0xff] }
 0x5b1   :  { %v3563_v10 = vpop.eup %3562  ;;  %3269 = vmatpush3.bf16.msra.mxu0 %v3266_v49  ;;  %3094 = vmatprep.mubr.msk.f32.mxu0 %vm1278_vm5, %v1436_v42  ;;  %v3463_v17 = vpack.i.bf16 %v3583_v20, %v3582_v46  ;;  %v2838_v49 = vld [vmem:[%s4373_s4 + $0x2] ss:$0 sm:$0xff] }
 0x5b2   :  { %v3565_v35 = vpop.eup %3564  ;;  %v1454_v62 = vmul.f32 %v3563_v10, %v4083_v28  ;;  %3088 = vmatmul.mubr.msk.f32.vlgmr.msra.gmra.mrb[28].mxu1 %vm1278_vm5, %v1450_v24  ;;  %v3584_v28 = vld [vmem:[%s4369_s3 + $0x10] sm:$0xff] }
 0x5b3   :  { %3273 = vmatpush3.bf16.msra.mxu1 %v3270_v13  ;;  %v1452_v0 = vmul.f32 %v3565_v35, %v4081_v21  ;;  %v3585_v21 = vld [vmem:[%s4369_s3 + $0x30] sm:$0xff]  ;;  %3464 = vrot.lane.b32.xlu1 %v3463_v17, %s3590_s25 }
 0x5b4   :  { %3095 = vmatmul.mubr.msk.f32.vlgmr.msra.gmra.mrb[14].mxu0 %vm1278_vm5, %v1438_v26  ;;  %v3458_v9 = vpack.i.bf16 %v3585_v21, %v3584_v28 }
 0x5b5   :  { %3101 = vmatprep.mubr.msk.f32.mxu1 %vm1278_vm5, %v1452_v0 }
 0x5b6   :  { %3102 = vmatmul.mubr.msk.f32.vlgmr.msra.gmra.mrb[30].mxu1 %vm1278_vm5, %v1454_v62  ;;  %3459 = vrot.lane.b32.xlu0 %v3458_v9, %s3590_s25 }
 0x625   :  { %v3465_v45 = vpop.permute.xlu1 %3464 }
 0x626   :  { %v3467_v48 = vunpack.i.h.bf16 %v3465_v45  ;;  %v3466_v7 = vunpack.i.l.bf16 %v3465_v45 }
 0x628   :  { %v3460_v40 = vpop.permute.xlu0 %3459  ;;  %v3278_v51 = vpack.c.bf16 %v3467_v48, %v3466_v7 }
 0x629   :  { %v3462_v38 = vunpack.i.h.bf16 %v3460_v40  ;;  %v3461_v12 = vunpack.i.l.bf16 %v3460_v40 }
 0x62b   :  { %v3274_v8 = vpack.c.bf16 %v3462_v38, %v3461_v12 }
 0x62d   :  { %3275 = vmatprep.subr.bf16.mxu0 %v3274_v8 }
 0x62e   :  { %3277 = vmatpush3.bf16.msra.mxu0 %v3274_v8 }
 0x62f   :  { %3279 = vmatprep.subr.bf16.mxu0 %v3278_v51 }
 0x632   :  { %3281 = vmatpush3.bf16.msra.mxu0 %v3278_v51 }
 0x668   :  { %v3054_v18 = vpop.f32.mrb[8].mxu0 }
 0x669   :  { %v1533_v52 = vpop.f32.mrb[9].mxu0 }
 0x670   :  { %v3061_v41 = vpop.f32.mrb[24].mxu1 }
 0x671   :  { %v1620_v29 = vpop.f32.mrb[25].mxu1 }
 0x674   :  { %v3068_v5 = vpop.f32.mrb[10].mxu0 }
 0x675   :  { %2157 = vrot.lane.b32.xlu1 %v3068_v5, %s3600_s18  ;;  %v1707_v57 = vpop.f32.mrb[11].mxu0 }
 0x676   :  { %2155 = vrot.lane.b32.xlu0 %v1707_v57, %s3600_s18 }
 0x67c   :  { %v3075_v54 = vpop.f32.mrb[26].mxu1 }
 0x67d   :  { %v3082_v36 = vpop.f32.mrb[12].mxu0  ;;  %v1794_v32 = vpop.f32.mrb[27].mxu1  ;;  %2161 = vrot.lane.b32.xlu1 %v3075_v54, %s3600_s18 }
 0x67e   :  { %v1881_v11 = vpop.f32.mrb[13].mxu0  ;;  %2159 = vrot.lane.b32.xlu0 %v1794_v32, %s3600_s18 }
 0x681   :  { %2173 = vrot.lane.b32.xlu1 %v3082_v36, %s3601_s19 }
 0x682   :  { %2171 = vrot.lane.b32.xlu0 %v1881_v11, %s3601_s19 }
 0x685   :  { %v3089_v63 = vpop.f32.mrb[28].mxu1 }
 0x686   :  { %2177 = vrot.lane.b32.xlu1 %v3089_v63, %s3601_s19  ;;  %v1968_v59 = vpop.f32.mrb[29].mxu1 }
 0x687   :  { %v3096_v55 = vpop.f32.mrb[14].mxu0  ;;  %2175 = vrot.lane.b32.xlu0 %v1968_v59, %s3601_s19 }
 0x688   :  { %v2055_v4 = vpop.f32.mrb[15].mxu0 }
 0x689   :  { %v3103_v1 = vpop.f32.mrb[30].mxu1 }
 0x68a   :  { %2189 = vrot.lane.b32.xlu1 %v3096_v55, %s3602_s20  ;;  %v2142_v56 = vpop.f32.mrb[31].mxu1 }
 0x68b   :  { %2187 = vrot.lane.b32.xlu0 %v2055_v4, %s3602_s20 }
 0x68e   :  { %2193 = vrot.lane.b32.xlu1 %v3103_v1, %s3602_s20 }
 0x68f   :  { %2191 = vrot.lane.b32.xlu0 %v2142_v56, %s3602_s20 }
 0x693   :  { %2229 = vrot.lane.b32.xlu0 %v2838_v49, %s3587_s11 }
 0x6e7   :  { %v2158_v14 = vpop.permute.xlu1 %2157 }
 0x6e8   :  { %v2156_v13 = vpop.permute.xlu0 %2155  ;;  %v2200_v0 = vsel %vm559_vm3, %v3054_v18, %v2158_v14 }
 0x6e9   :  { %v2199_v26 = vsel %vm559_vm3, %v1533_v52, %v2156_v13 }
 0x6ef   :  { %v2162_v44 = vpop.permute.xlu1 %2161 }
 0x6f0   :  { %v2160_v19 = vpop.permute.xlu0 %2159  ;;  %v2202_v40 = vsel %vm559_vm3, %v3061_v41, %v2162_v44 }
 0x6f1   :  { %v2201_v9 = vsel %vm559_vm3, %v1620_v29, %v2160_v19 }
 0x6f3   :  { %v2174_v42 = vpop.permute.xlu1 %2173 }
 0x6f4   :  { %v2172_v24 = vpop.permute.xlu0 %2171  ;;  %v2204_v17 = vsel %vm1278_vm5, %v2200_v0, %v2174_v42 }
 0x6f5   :  { %v2203_v46 = vsel %vm1278_vm5, %v2199_v26, %v2172_v24 }
 0x6f8   :  { %v2178_v10 = vpop.permute.xlu1 %2177 }
 0x6f9   :  { %v2176_v35 = vpop.permute.xlu0 %2175  ;;  %v2206_v38 = vsel %vm1278_vm5, %v2202_v40, %v2178_v10 }
 0x6fa   :  { %v2205_v48 = vsel %vm1278_vm5, %v2201_v9, %v2176_v35 }
 0x6fc   :  { %v2190_v62 = vpop.permute.xlu1 %2189 }
 0x6fd   :  { %v2188_v20 = vpop.permute.xlu0 %2187  ;;  %v2209_v21 = vsel %vm2207_vm6, %v2204_v17, %v2190_v62  ;;  %v37_v62 = vld [vmem:[%s4369_s3 + $0x58] sm:$0xff] }
 0x6fe   :  { %v2208_v28 = vsel %vm2207_vm6, %v2203_v46, %v2188_v20  ;;  %v36_v46 = vld [vmem:[%s4369_s3 + $0x38] sm:$0xff] }
 0x6ff   :  { %3112 = vmatprep.mubr.msk.f32.mxu0 %vm52_vm0, %v2208_v28 }
 0x700   :  { %3113 = vmatmul.mubr.msk.f32.vlgmr.msra.gmra.mrb[16].mxu0 %vm52_vm0, %v2209_v21  ;;  %v2194_v45 = vpop.permute.xlu1 %2193 }
 0x701   :  { %v2192_v7 = vpop.permute.xlu0 %2191  ;;  %v2211_v18 = vsel %vm2207_vm6, %v2206_v38, %v2194_v45 }
 0x702   :  { %v2210_v12 = vsel %vm2207_vm6, %v2205_v48, %v2192_v7 }
 0x703   :  { %3115 = vmatprep.mubr.msk.f32.mxu0 %vm52_vm0, %v2210_v12 }
 0x704   :  { %3116 = vmatmul.mubr.msk.f32.gmra.mrb[18].mxu0 %vm52_vm0, %v2211_v18 }
 0x705   :  { %v2230_v51 = vpop.permute.xlu0 %2229 }
 0x7d3   :  { %v3114_v8 = vpop.f32.mrb[16].mxu0 }
 0x7d4   :  { %v2316_v52 = vadd.f32 %v3114_v8, %v2230_v51  ;;  %v2310_v29 = vpop.f32.mrb[17].mxu0 }
 0x7d5   :  { %v2311_v5 = vadd.f32 %v2310_v29, %v2230_v51 }
 0x7d6   :  { %2335 = vrot.lane.b32.xlu0 %v2316_v52, %s3590_s25 }
 0x7d7   :  { %v3117_v41 = vpop.f32.mrb[18].mxu0  ;;  %2333 = vrot.lane.b32.xlu1 %v2311_v5, %s3590_s25 }
 0x7d8   :  { %v2326_v57 = vadd.f32 %v3117_v41, %v2230_v51  ;;  %v2320_v54 = vpop.f32.mrb[19].mxu0 }
 0x7d9   :  { %v2321_v36 = vadd.f32 %v2320_v54, %v2230_v51 }
 0x7da   :  { %2339 = vrot.lane.b32.xlu0 %v2326_v57, %s3590_s25 }
 0x7db   :  { %2337 = vrot.lane.b32.xlu1 %v2321_v36, %s3590_s25 }
 0x848   :  { %v2336_v32 = vpop.permute.xlu0 %2335 }
 0x849   :  { %v2346_v11 = vmul.f32 %v2336_v32, %v3780_v33  ;;  %v2334_v63 = vpop.permute.xlu1 %2333 }
 0x84a   :  { %v2345_v59 = vmul.f32 %v2334_v63, %v3775_v30 }
 0x84b   :  { %2355 = vrot.lane.b32.xlu0 %v2346_v11, %s3590_s25 }
 0x84c   :  { %v2340_v55 = vpop.permute.xlu0 %2339  ;;  %2353 = vrot.lane.b32.xlu1 %v2345_v59, %s3590_s25 }
 0x84d   :  { %v2348_v4 = vmul.f32 %v2340_v55, %v3841_v23  ;;  %v2338_v1 = vpop.permute.xlu1 %2337 }
 0x84e   :  { %v2347_v56 = vmul.f32 %v2338_v1, %v3839_v22 }
 0x84f   :  { %2359 = vrot.lane.b32.xlu0 %v2348_v4, %s3590_s25 }
 0x850   :  { %2357 = vrot.lane.b32.xlu1 %v2347_v56, %s3590_s25 }
 0x8bd   :  { %v2356_v49 = vpop.permute.xlu0 %2355 }
 0x8be   :  { %v4172_v14 = vadd.f32 %v2356_v49, %v3724_v3  ;;  %v2354_v13 = vpop.permute.xlu1 %2353 }
 0x8bf   :  { %v4175_v44 = vadd.f32 %v2354_v13, %v3726_v6 }
 0x8c0   :  { %v2372_v19 = vsel %vm52_vm0, %v4172_v14, 0.0 }
 0x8c1   :  { %2373 = vadd.xlane.f32.xlu0 %v2372_v19  ;;  %v2360_v42 = vpop.permute.xlu0 %2359  ;;  %v2369_v24 = vsel %vm52_vm0, %v4175_v44, 0.0 }
 0x8c2   :  { %v4182_v10 = vadd.f32 %v2360_v42, %v3738_v15  ;;  %2370 = vadd.xlane.f32.xlu1 %v2369_v24  ;;  %v2358_v35 = vpop.permute.xlu1 %2357  ;;  %v38_v15 = vld [vmem:[%s4369_s3 + $0x78] sm:$0xff] }
 0x8c3   :  { %v4185_v3 = vadd.f32 %v2358_v35, %v3740_v16  ;;  %v3473_v0 = vpack.i.bf16 %v38_v15, %v37_v62  ;;  %v35_v16 = vld [vmem:[%s4369_s3 + $0x18] sm:$0xff] }
 0x8c4   :  { %v2378_v6 = vsel %vm52_vm0, %v4182_v10, 0.0  ;;  %v3468_v20 = vpack.i.bf16 %v36_v46, %v35_v16 }
 0x8c5   :  { %v2375_v26 = vsel %vm52_vm0, %v4185_v3, 0.0 }
 0x8c6   :  { %2379 = vadd.xlane.f32.xlu1 %v2378_v6  ;;  %2376 = vadd.xlane.f32.xlu0 %v2375_v26 }
 0x8d7   :  { %3474 = vrot.lane.b32.xlu1 %v3473_v0, %s3589_s16 }
 0x8db   :  { %2433 = vrot.lane.b32.xlu1 %v3775_v30, %s3589_s16 }
 0x8dc   :  { %3469 = vrot.lane.b32.xlu0 %v3468_v20, %s3589_s16 }
 0x94e   :  { %v2374_v17 = vpop.xlane.xlu0 %2373 }
 0x94f   :  { %v2382_v28 = vmul.f32 0.03125, %v2374_v17  ;;  %v2371_v21 = vpop.xlane.xlu1 %2370 }
 0x950   :  { %v2381_v9 = vmul.f32 0.03125, %v2371_v21 }
 0x951   :  { %v4208_v45 = vsub.f32 %v4172_v14, %v2382_v28 }
 0x952   :  { %v4211_v40 = vsub.f32 %v4175_v44, %v2381_v9 }
 0x953   :  { %v2377_v48 = vpop.xlane.xlu0 %2376  ;;  %v2380_v7 = vpop.xlane.xlu1 %2379  ;;  %v2390_v38 = vmul.f32 %v4208_v45, %v4208_v45 }
 0x954   :  { %v2383_v12 = vmul.f32 0.03125, %v2377_v48  ;;  %v2384_v18 = vmul.f32 0.03125, %v2380_v7  ;;  %v2389_v30 = vmul.f32 %v4211_v40, %v4211_v40 }
 0x955   :  { %v2396_v51 = vsel %vm52_vm0, %v2390_v38, 0.0 }
 0x956   :  { %v4219_v8 = vsub.f32 %v4185_v3, %v2383_v12  ;;  %v4222_v52 = vsub.f32 %v4182_v10, %v2384_v18  ;;  %2397 = vadd.xlane.f32.xlu1 %v2396_v51  ;;  %v2393_v29 = vsel %vm52_vm0, %v2389_v30, 0.0 }
 0x957   :  { %v3470_v5 = vpop.permute.xlu0 %3469  ;;  %2394 = vadd.xlane.f32.xlu0 %v2393_v29  ;;  %v3475_v41 = vpop.permute.xlu1 %3474 }
 0x958   :  { %v3472_v57 = vunpack.i.h.bf16 %v3470_v5  ;;  %v3471_v54 = vunpack.i.l.bf16 %v3470_v5  ;;  %v3477_v36 = vunpack.i.h.bf16 %v3475_v41  ;;  %v3476_v32 = vunpack.i.l.bf16 %v3475_v41 }
 0x959   :  { %v2391_v11 = vmul.f32 %v4219_v8, %v4219_v8  ;;  %v2392_v63 = vmul.f32 %v4222_v52, %v4222_v52 }
 0x95a   :  { %v2470_v59 = vsel %vm52_vm0, %v3362_v50, %v3471_v54  ;;  %v2471_v55 = vsel %vm52_vm0, %v3367_v2, %v3472_v57  ;;  %v2472_v4 = vsel %vm52_vm0, %v3372_v53, %v3476_v32  ;;  %v2473_v1 = vsel %vm52_vm0, %v3377_v61, %v3477_v36  ;;  %v2619_v36 = vld [vmem:[%s4374_s5 + $0x10] sm:$0xff]  ;;  %v2620_v32 = vld [vmem:[%s4374_s5 + $0x18] sm:$0xff] }
 0x95b   :  { %v2399_v56 = vsel %vm52_vm0, %v2391_v11, 0.0  ;;  %v2402_v49 = vsel %vm52_vm0, %v2392_v63, 0.0  ;;  %v3282_v13 = vpack.c.bf16 %v2471_v55, %v2470_v59  ;;  %v3286_v43 = vpack.c.bf16 %v2473_v1, %v2472_v4  ;;  %v2434_v58 = vpop.permute.xlu1 %2433  ;;  %v2621_v63 = vld [vmem:[%s4374_s5 + $0x20] sm:$0xff]  ;;  %v2622_v59 = vld [vmem:[%s4374_s5 + $0x28] sm:$0xff]  ;;  %v2623_v4 = vld [vmem:[%s4374_s5 + $0x30] sm:$0xff] }
 0x95c   :  { %2400 = vadd.xlane.f32.xlu0 %v2399_v56  ;;  %2403 = vadd.xlane.f32.xlu1 %v2402_v49  ;;  %v2457_v50 = vrot.slane %v42_v47, %v3848_v25  ;;  %v2453_v53 = vrot.slane %v42_v47, %v3769_v27  ;;  %v3586_v27 = vld [vmem:[%s4373_s4] sm:$0x3]  ;;  %v3294_v11 = vpack.c.bf16 %v2620_v32, %v2619_v36  ;;  %v2624_v1 = vld [vmem:[%s4374_s5 + $0x38] sm:$0xff]  ;;  %v2627_v47 = vld [vmem:[%s4374_s5 + $0x50] sm:$0xff] }
 0x95d   :  { %3283 = vmatprep.subr.bf16.mxu1 %v3282_v13  ;;  %v190_v6 = vrot.slane %v3586_v27, %v3848_v25  ;;  %v3298_v55 = vpack.c.bf16 %v2622_v59, %v2621_v63  ;;  %v3302_v56 = vpack.c.bf16 %v2624_v1, %v2623_v4  ;;  %v2625_v49 = vld [vmem:[%s4374_s5 + $0x40] sm:$0xff] }
 0x95e   :  { %3285 = vmatpush3.bf16.msra.mxu1 %v3282_v13  ;;  %v2626_v13 = vld [vmem:[%s4374_s5 + $0x48] sm:$0xff] }
 0x95f   :  { %3287 = vmatprep.subr.bf16.mxu1 %v3286_v43  ;;  %v4261_v15 = vadd.f32 %v3782_v34, %v190_v6  ;;  %v4264_v0 = vadd.f32 %v3777_v31, %v190_v6  ;;  %v4271_v21 = vadd.f32 %v3787_v37, %v190_v6  ;;  %v4274_v34 = vadd.f32 %v3789_v39, %v190_v6 }
 0x961   :  { %v2422_v20 = vadd.f32 1.0, %v4261_v15  ;;  %v2421_v28 = vadd.f32 1.0, %v4264_v0  ;;  %v2423_v18 = vadd.f32 1.0, %v4271_v21  ;;  %v2424_v51 = vadd.f32 1.0, %v4274_v34 }
 0x962   :  { %3289 = vmatpush3.bf16.msra.mxu1 %v3286_v43  ;;  %v3306_v43 = vpack.c.bf16 %v2626_v13, %v2625_v49 }
 0x96d   :  { %2437 = vrot.lane.b32.xlu1 %v3839_v22, %s3589_s16 }
 0x971   :  { %2478 = vrot.lane.b32.xlu1 %v2453_v53, %s3590_s25 }
 0x972   :  { %2435 = vrot.lane.b32.xlu0 %v3780_v33, %s3589_s16 }
 0x976   :  { %2439 = vrot.lane.b32.xlu0 %v3841_v23, %s3589_s16 }
 0x97a   :  { %2480 = vrot.lane.b32.xlu0 %v2457_v50, %s3590_s25  ;;  %v2628_v50 = vld [vmem:[%s4374_s5 + $0x58] sm:$0xff] }
 0x97b   :  { %v3310_v53 = vpack.c.bf16 %v2628_v50, %v2627_v47 }
 0x9e3   :  { %v2398_v60 = vpop.xlane.xlu1 %2397 }
 0x9e4   :  { %v2406_v61 = vmul.f32 0.03125, %v2398_v60  ;;  %v2395_v2 = vpop.xlane.xlu0 %2394  ;;  %v2630_v60 = vld [vmem:[%s4374_s5 + $0x68] sm:$0xff] }
 0x9e5   :  { %v2405_v33 = vmul.f32 0.03125, %v2395_v2  ;;  %v2631_v2 = vld [vmem:[%s4374_s5 + $0x70] sm:$0xff] }
 0x9e6   :  { %v2410_v22 = vadd.f32 1e-06, %v2406_v61 }
 0x9e7   :  { %v2409_v19 = vadd.f32 1e-06, %v2405_v33  ;;  %v2632_v33 = vld [vmem:[%s4374_s5 + $0x78] sm:$0xff] }
 0x9e8   :  { %3566 = vrsqrt.f32 %v2410_v22  ;;  %v3318_v22 = vpack.c.bf16 %v2632_v33, %v2631_v2 }
 0x9e9   :  { %3568 = vrsqrt.f32 %v2409_v19  ;;  %v2401_v23 = vpop.xlane.xlu0 %2400  ;;  %v2404_v42 = vpop.xlane.xlu1 %2403  ;;  %v2847_v19 = vld [vmem:[%s4373_s4 + $0x3] ss:$0 sm:$0xff] }
 0x9ea   :  { %v2407_v24 = vmul.f32 0.03125, %v2401_v23  ;;  %v2408_v35 = vmul.f32 0.03125, %v2404_v42  ;;  %2638 = vrot.lane.b32.xlu1 %v2847_v19, %s3590_s25 }
 0x9ec   :  { %v2411_v26 = vadd.f32 1e-06, %v2407_v24  ;;  %v2412_v62 = vadd.f32 1e-06, %v2408_v35 }
 0x9ed   :  { %v2436_v31 = vpop.permute.xlu0 %2435  ;;  %v2438_v39 = vpop.permute.xlu1 %2437 }
 0x9ee   :  { %3570 = vrsqrt.f32 %v2411_v26 }
 0x9ef   :  { %3572 = vrsqrt.f32 %v2412_v62 }
 0x9f1   :  { %v2440_v41 = vpop.permute.xlu0 %2439  ;;  %v2479_v42 = vpop.permute.xlu1 %2478 }
 0x9f2   :  { %v3567_v16 = vpop.eup %3566 }
 0x9f3   :  { %v3569_v46 = vpop.eup %3568  ;;  %v2418_v17 = vmul.f32 %v3567_v16, %v4208_v45 }
 0x9f4   :  { %v2417_v25 = vmul.f32 %v3569_v46, %v4211_v40 }
 0x9f5   :  { %v2426_v9 = vmul.f32 %v2422_v20, %v2418_v17  ;;  %v2481_v23 = vpop.permute.xlu0 %2480 }
 0x9f6   :  { %v2425_v48 = vmul.f32 %v2421_v28, %v2417_v25  ;;  %v2482_v24 = vsel %vm453_vm2, %v2479_v42, %v2481_v23 }
 0x9f7   :  { %v2446_v30 = vadd.f32 %v2436_v31, %v2426_v9 }
 0x9f8   :  { %v3571_v7 = vpop.eup %3570  ;;  %v2445_v38 = vadd.f32 %v2434_v58, %v2425_v48  ;;  %v2629_v58 = vld [vmem:[%s4374_s5 + $0x60] sm:$0xff] }
 0x9f9   :  { %v3573_v12 = vpop.eup %3572  ;;  %v2419_v45 = vmul.f32 %v3571_v7, %v4219_v8  ;;  %v2617_v8 = vld [vmem:[%s4374_s5] sm:$0xff]  ;;  %v3314_v61 = vpack.c.bf16 %v2630_v60, %v2629_v58 }
 0x9fa   :  { %v2420_v40 = vmul.f32 %v3573_v12, %v4222_v52  ;;  %3126 = vmatprep.mubr.msk.f32.mxu1 %vm52_vm0, %v2445_v38  ;;  %v2618_v52 = vld [vmem:[%s4374_s5 + $0x8] sm:$0xff] }
 0x9fb   :  { %v2427_v37 = vmul.f32 %v2423_v18, %v2419_v45  ;;  %3127 = vmatmul.mubr.msk.f32.vlgmr.msra.gmra.mrb[32].mxu1 %vm52_vm0, %v2446_v30  ;;  %v3290_v54 = vpack.c.bf16 %v2618_v52, %v2617_v8 }
 0x9fc   :  { %v2428_v29 = vmul.f32 %v2424_v51, %v2420_v40 }
 0x9fd   :  { %v2447_v5 = vadd.f32 %v2438_v39, %v2427_v37  ;;  %3291 = vmatprep.subr.bf16.mxu0 %v3290_v54 }
 0x9fe   :  { %v2448_v57 = vadd.f32 %v2440_v41, %v2428_v29  ;;  %3293 = vmatpush3.bf16.msra.mxu0 %v3290_v54 }
 0x9ff   :  { %3129 = vmatprep.mubr.msk.f32.mxu1 %vm52_vm0, %v2447_v5  ;;  %3295 = vmatprep.subr.bf16.mxu0 %v3294_v11 }
 0xa00   :  { %3130 = vmatmul.mubr.msk.f32.gmra.mrb[34].mxu1 %vm52_vm0, %v2448_v57 }
 0xa02   :  { %3297 = vmatpush3.bf16.msra.mxu0 %v3294_v11 }
 0xa03   :  { %3299 = vmatprep.subr.bf16.mxu0 %v3298_v55 }
 0xa06   :  { %3301 = vmatpush3.bf16.msra.mxu0 %v3298_v55 }
 0xa07   :  { %3303 = vmatprep.subr.bf16.mxu0 %v3302_v56 }
 0xa0a   :  { %3305 = vmatpush3.bf16.msra.mxu0 %v3302_v56 }
 0xa0b   :  { %3307 = vmatprep.subr.bf16.mxu0 %v3306_v43 }
 0xa0e   :  { %3309 = vmatpush3.bf16.msra.mxu0 %v3306_v43 }
 0xa0f   :  { %3311 = vmatprep.subr.bf16.mxu0 %v3310_v53 }
 0xa12   :  { %3313 = vmatpush3.bf16.msra.mxu0 %v3310_v53 }
 0xa13   :  { %3315 = vmatprep.subr.bf16.mxu0 %v3314_v61 }
 0xa16   :  { %3317 = vmatpush3.bf16.msra.mxu0 %v3314_v61 }
 0xa17   :  { %3319 = vmatprep.subr.bf16.mxu0 %v3318_v22 }
 0xa1a   :  { %3321 = vmatpush3.bf16.msra.mxu0 %v3318_v22 }
 0xa5c   :  { %v2639_v50 = vpop.permute.xlu1 %2638 }
 0xace   :  { %v3128_v35 = vpop.f32.mrb[32].mxu1 }
 0xacf   :  { %v2568_v27 = vadd.f32 %v3128_v35, %v2482_v24  ;;  %v2562_v6 = vpop.f32.mrb[33].mxu1 }
 0xad0   :  { %v2563_v26 = vadd.f32 %v2562_v6, %v2482_v24 }
 0xad1   :  { %v2582_v62 = vmul.f32 %v2568_v27, %v2568_v27 }
 0xad2   :  { %v2581_v16 = vmul.f32 %v2563_v26, %v2563_v26 }
 0xad3   :  { %v2586_v46 = vmul.f32 %v2582_v62, %v2568_v27  ;;  %v3131_v20 = vpop.f32.mrb[34].mxu1 }
 0xad4   :  { %v2585_v17 = vmul.f32 %v2581_v16, %v2563_v26  ;;  %v2578_v28 = vadd.f32 %v3131_v20, %v2482_v24  ;;  %v2572_v25 = vpop.f32.mrb[35].mxu1 }
 0xad5   :  { %v2590_v9 = vmul.f32 0.044715, %v2586_v46  ;;  %v2573_v48 = vadd.f32 %v2572_v25, %v2482_v24 }
 0xad6   :  { %v2589_v31 = vmul.f32 0.044715, %v2585_v17  ;;  %v2584_v7 = vmul.f32 %v2578_v28, %v2578_v28 }
 0xad7   :  { %v2594_v38 = vadd.f32 %v2590_v9, %v2568_v27  ;;  %v2583_v12 = vmul.f32 %v2573_v48, %v2573_v48 }
 0xad8   :  { %v2593_v18 = vadd.f32 %v2589_v31, %v2563_v26  ;;  %v2588_v30 = vmul.f32 %v2584_v7, %v2578_v28 }
 0xad9   :  { %v2598_v45 = vmul.f32 0.7978846, %v2594_v38  ;;  %v2587_v51 = vmul.f32 %v2583_v12, %v2573_v48 }
 0xada   :  { %v2597_v40 = vmul.f32 0.7978846, %v2593_v18  ;;  %v2592_v37 = vmul.f32 0.044715, %v2588_v30 }
 0xadb   :  { %3574 = vtanh.f32 %v2598_v45  ;;  %v2591_v39 = vmul.f32 0.044715, %v2587_v51 }
 0xadc   :  { %v2596_v29 = vadd.f32 %v2592_v37, %v2578_v28  ;;  %3576 = vtanh.f32 %v2597_v40 }
 0xadd   :  { %v2595_v5 = vadd.f32 %v2591_v39, %v2573_v48 }
 0xade   :  { %v2600_v41 = vmul.f32 0.7978846, %v2596_v29 }
 0xadf   :  { %v2599_v57 = vmul.f32 0.7978846, %v2595_v5 }
 0xae0   :  { %3578 = vtanh.f32 %v2600_v41 }
 0xae1   :  { %3580 = vtanh.f32 %v2599_v57 }
 0xae5   :  { %v3575_v8 = vpop.eup %3574 }
 0xae6   :  { %v3577_v52 = vpop.eup %3576  ;;  %v2606_v54 = vadd.f32 1.0, %v3575_v8 }
 0xae7   :  { %v2605_v36 = vadd.f32 1.0, %v3577_v52 }
 0xae8   :  { %v2610_v32 = vmul.f32 0.5, %v2606_v54 }
 0xae9   :  { %v2609_v11 = vmul.f32 0.5, %v2605_v36 }
 0xaea   :  { %v3579_v63 = vpop.eup %3578  ;;  %v2614_v1 = vmul.f32 %v2610_v32, %v2568_v27 }
 0xaeb   :  { %v3581_v59 = vpop.eup %3580  ;;  %v2613_v55 = vmul.f32 %v2609_v11, %v2563_v26  ;;  %v2608_v4 = vadd.f32 1.0, %v3579_v63 }
 0xaec   :  { %v2607_v56 = vadd.f32 1.0, %v3581_v59 }
 0xaed   :  { %3164 = vmatprep.mubr.f32.mxu0 %v2613_v55  ;;  %v2612_v49 = vmul.f32 0.5, %v2608_v4 }
 0xaee   :  { %3165 = vmatmul.mubr.f32.vlgmr.msra.gmra.mrb[20].mxu0 %v2614_v1  ;;  %v2611_v13 = vmul.f32 0.5, %v2607_v56 }
 0xaef   :  { %v2616_v47 = vmul.f32 %v2612_v49, %v2578_v28 }
 0xaf0   :  { %v2615_v43 = vmul.f32 %v2611_v13, %v2573_v48 }
 0xaf2   :  { %3167 = vmatprep.mubr.f32.mxu0 %v2615_v43 }
 0xaf3   :  { %3168 = vmatmul.mubr.f32.gmra.mrb[22].mxu0 %v2616_v47 }
 0xbc1   :  { %v3166_v53 = vpop.f32.mrb[20].mxu0 }
 0xbc2   :  { %v2713_v58 = vadd.f32 %v3166_v53, %v2639_v50  ;;  %v2707_v60 = vpop.f32.mrb[21].mxu0 }
 0xbc3   :  { %v2708_v61 = vadd.f32 %v2707_v60, %v2639_v50 }
 0xbc4   :  { %2732 = vrot.lane.b32.xlu1 %v2713_v58, %s3589_s16 }
 0xbc5   :  { %2730 = vrot.lane.b32.xlu0 %v2708_v61, %s3589_s16 }
 0xbc6   :  { %v3169_v2 = vpop.f32.mrb[22].mxu0 }
 0xbc7   :  { %v2723_v33 = vadd.f32 %v3169_v2, %v2639_v50  ;;  %v2717_v22 = vpop.f32.mrb[23].mxu0 }
 0xbc8   :  { %v2718_v19 = vadd.f32 %v2717_v22, %v2639_v50 }
 0xbc9   :  { %2736 = vrot.lane.b32.xlu1 %v2723_v33, %s3589_s16 }
 0xbca   :  { %2734 = vrot.lane.b32.xlu0 %v2718_v19, %s3589_s16 }
 0xc36   :  { %v2733_v23 = vpop.permute.xlu1 %2732 }
 0xc37   :  { %v2743_v42 = vmul.f32 %v2733_v23, %v4261_v15  ;;  %v2731_v24 = vpop.permute.xlu0 %2730 }
 0xc38   :  { %v2742_v35 = vmul.f32 %v2731_v24, %v4264_v0 }
 0xc39   :  { %2752 = vrot.lane.b32.xlu1 %v2743_v42, %s3587_s11 }
 0xc3a   :  { %2750 = vrot.lane.b32.xlu0 %v2742_v35, %s3587_s11 }
 0xc3b   :  { %v2737_v27 = vpop.permute.xlu1 %2736 }
 0xc3c   :  { %v2745_v6 = vmul.f32 %v2737_v27, %v4274_v34  ;;  %v2735_v26 = vpop.permute.xlu0 %2734 }
 0xc3d   :  { %v2744_v62 = vmul.f32 %v2735_v26, %v4271_v21 }
 0xc3e   :  { %2756 = vrot.lane.b32.xlu1 %v2745_v6, %s3587_s11 }
 0xc3f   :  { %2754 = vrot.lane.b32.xlu0 %v2744_v62, %s3587_s11 }
 0xcab   :  { %v2753_v16 = vpop.permute.xlu1 %2752 }
 0xcac   :  { %v2763_v15 = vadd.f32 %v2753_v16, %v4172_v14  ;;  %v2751_v46 = vpop.permute.xlu0 %2750 }
 0xcad   :  { %v2762_v0 = vadd.f32 %v2751_v46, %v4175_v44 }
 0xcae   :  { %2767 = vst.msk [vmem:[%s4375_s6 + $0x8] sm:$0xff] %vm52_vm0, %v2763_v15 }
 0xcaf   :  { %2766 = vst.msk [vmem:[%s4375_s6] sm:$0xff] %vm52_vm0, %v2762_v0 }
 0xcb0   :  { %v2757_v21 = vpop.permute.xlu1 %2756 }
 0xcb1   :  { %v2765_v34 = vadd.f32 %v2757_v21, %v4182_v10  ;;  %v2755_v20 = vpop.permute.xlu0 %2754 }
 0xcb2   :  { %v2764_v17 = vadd.f32 %v2755_v20, %v4185_v3 }
 0xcb3   :  { %2769 = vst.msk [vmem:[%s4375_s6 + $0x18] sm:$0xff] %vm52_vm0, %v2765_v34 }
 0xcb4   :  { %2768 = vst.msk [vmem:[%s4375_s6 + $0x10] sm:$0xff] %vm52_vm0, %v2764_v17 }

</bundles_post_ra>
